<compile_context>
chip_gen: v5e
topology: v5e:2x2
jax: 0.10.0
libtpu: 0.0.40
codegen_flags: <defaults>
</compile_context>

<pallas_src>
import functools

import jax
import jax.numpy as jnp
import numpy as np
from jax import lax
from jax.experimental import pallas as pl
from jax.experimental.pallas import tpu as pltpu


# ----------------------------------------------------------------------------
# Fused kernel: embedding gather + multi-layer LSTM wavefront, all in VMEM.
# ----------------------------------------------------------------------------
def _make_encoder_kernel(n_layers, seq_len, batch_p):
    T, Bp, L = seq_len, batch_p, n_layers

    def kernel(*refs):
        # refs = (src, emb_table, w_ih0, w_hh0, b0,
        #         [w_cat_l, b_l for l in 1..L-1], h_out, c_out)
        src_ref, emb_ref, w_ih0_ref, w_hh0_ref, b0_ref = refs[:5]
        layer_refs = refs[5:5 + 2 * (L - 1)]
        h_out, c_out = refs[5 + 2 * (L - 1):]

        V, _E = emb_ref.shape
        H = w_hh0_ref.shape[0]
        TB = T * Bp

        # ------- fused embedding gather: one-hot matmul on the MXU ----------
        tok = src_ref[...]                                     # (TB, 1) int32
        vocab_ids = lax.broadcasted_iota(jnp.int32, (TB, V), 1)
        onehot = (tok == vocab_ids).astype(jnp.float32)        # (TB, V)
        x0 = jnp.dot(onehot, emb_ref[...],
                     preferred_element_type=jnp.float32)       # (TB, E)
        # TODO(synk): dropout on x0 is identity (eval mode); add pltpu.prng_*
        # based dropout here if training-mode equivalence is ever needed.

        # ------- hoisted layer-0 input projection (whole sequence) ----------
        gx0 = jnp.dot(x0, w_ih0_ref[...],
                      preferred_element_type=jnp.float32) + b0_ref[...]  # (TB,4H)

        w_hh0 = w_hh0_ref[...]                                  # (H, 4H)
        w_cat = [None] + [layer_refs[2 * (l - 1)][...] for l in range(1, L)]
        b_l = [None] + [layer_refs[2 * (l - 1) + 1][...] for l in range(1, L)]

        h = [jnp.zeros((Bp, H), jnp.float32) for _ in range(L)]
        c = [jnp.zeros((Bp, H), jnp.float32) for _ in range(L)]

        # ------- wavefront recurrence: step s does (layer l, t = s - l) ------
        # TODO(synk): for long sequences switch the unrolled wavefront to a
        # lax.fori_loop with unroll=4..8 and pl.ds/pl.multiple_of gx slices to
        # bound code size / vreg pressure.
        for s in range(T + L - 1):
            h_prev = list(h)      # state as of the end of step s-1
            c_prev = list(c)
            for l in range(L):
                t = s - l
                if not (0 <= t < T):
                    continue
                if l == 0:
                    gates = gx0[t * Bp:(t + 1) * Bp, :] + jnp.dot(
                        h_prev[0], w_hh0, preferred_element_type=jnp.float32)
                else:
                    # Input (h of layer l-1 at time t, computed last step) and
                    # own recurrent state share ONE matmul via concatenation.
                    inp = jnp.concatenate([h_prev[l - 1], h_prev[l]], axis=-1)
                    gates = jnp.dot(inp, w_cat[l],
                                    preferred_element_type=jnp.float32) + b_l[l]
                # Lane-dense activations: one full-width sigmoid + one tanh.
                sig = jax.nn.sigmoid(gates)                    # (Bp, 4H)
                tnh = jnp.tanh(gates)                          # (Bp, 4H)
                i_g = sig[:, 0 * H:1 * H]
                f_g = sig[:, 1 * H:2 * H]
                g_g = tnh[:, 2 * H:3 * H]
                o_g = sig[:, 3 * H:4 * H]
                c_new = f_g * c_prev[l] + i_g * g_g
                h_new = o_g * jnp.tanh(c_new)
                h[l] = h_new
                c[l] = c_new
        # The last layer's sequence output is dead (encoder returns only
        # (hidden, cell)) and is never materialized.

        for l in range(L):
            h_out[l] = h[l]
            c_out[l] = c[l]

    return kernel


# ----------------------------------------------------------------------------
# Full encoder forward: one fused Pallas call (gather + all layers + all T).
# ----------------------------------------------------------------------------
def encoder_forward(src, params, n_layers):
    T, B = src.shape
    H = params["w_hh_0"].shape[0]

    # Pad batch to a full sublane tile so every vreg/store is 8-row aligned.
    Bp = max(8, ((B + 7) // 8) * 8)
    src_p = jnp.pad(src.astype(jnp.int32), ((0, 0), (0, Bp - B)))  # pad tok = 0
    src_flat = src_p.reshape(T * Bp, 1)

    args = [src_flat,
            params["embedding"].astype(jnp.float32),
            params["w_ih_0"], params["w_hh_0"], params["b_0"]]
    for l in range(1, n_layers):
        # Pre-concatenate [W_ih; W_hh] so the per-step projection is 1 matmul.
        w_cat = jnp.concatenate(
            [params[f"w_ih_{l}"], params[f"w_hh_{l}"]], axis=0)   # (2H, 4H)
        args += [w_cat, params[f"b_{l}"]]
    # TODO(synk): for H >= 128 cast weights/activations to bf16 (accumulate in
    # f32 via preferred_element_type) for native MXU throughput on v6e/v7x.
    # TODO(synk): for large batch, shard the (padded) batch across TensorCores
    # with a leading "parallel" grid axis; pointless at B=2.

    vmem = pl.BlockSpec(memory_space=pltpu.MemorySpace.VMEM)
    hidden_p, cell_p = pl.pallas_call(
        _make_encoder_kernel(n_layers, T, Bp),
        out_shape=(jax.ShapeDtypeStruct((n_layers, Bp, H), jnp.float32),
                   jax.ShapeDtypeStruct((n_layers, Bp, H), jnp.float32)),
        in_specs=[vmem] * len(args),
        out_specs=(vmem, vmem),
        compiler_params=pltpu.CompilerParams(
            # Explicit budget for the all-resident (no BlockSpec tiling)
            # design; tiny here, but keeps the kernel inside the scoped limit
            # on every generation (v5e 16 MiB default, v7x 64 MiB physical).
            vmem_limit_bytes=32 * 1024 * 1024),
    )(*args)
    # Drop batch padding.
    return hidden_p[:, :B, :], cell_p[:, :B, :]


# ----------------------------------------------------------------------------
# Pure-JAX reference (lax.scan LSTM) for a correctness check.
# ----------------------------------------------------------------------------
def encoder_reference(src, params, n_layers):
    emb = jnp.take(params["embedding"], src, axis=0).astype(jnp.float32)
    x = emb
    hs, cs = [], []
    for l in range(n_layers):
        w_ih = params[f"w_ih_{l}"]
        w_hh = params[f"w_hh_{l}"]
        b = params[f"b_{l}"][0]
        H = w_hh.shape[0]
        B = x.shape[1]

        def step(carry, x_t):
            h, c = carry
            gates = x_t @ w_ih + h @ w_hh + b
            i = jax.nn.sigmoid(gates[:, 0 * H:1 * H])
            f = jax.nn.sigmoid(gates[:, 1 * H:2 * H])
            g = jnp.tanh(gates[:, 2 * H:3 * H])
            o = jax.nn.sigmoid(gates[:, 3 * H:4 * H])
            c = f * c + i * g
            h = o * jnp.tanh(c)
            return (h, c), h

        init = (jnp.zeros((B, H), jnp.float32), jnp.zeros((B, H), jnp.float32))
        (h_fin, c_fin), out = lax.scan(step, init, x)
        x = out
        hs.append(h_fin)
        cs.append(c_fin)
    return jnp.stack(hs, 0), jnp.stack(cs, 0)


# ----------------------------------------------------------------------------
# Deterministic parameter init (shapes per nn.Embedding / nn.LSTM).
# ----------------------------------------------------------------------------
def init_params(key, input_dim, emb_dim, hid_dim, n_layers):
    params = {}
    keys = jax.random.split(key, 1 + 4 * n_layers)
    # nn.Embedding default init: N(0, 1)
    params["embedding"] = jax.random.normal(
        keys[0], (input_dim, emb_dim), jnp.float32)
    k = 1.0 / np.sqrt(hid_dim)
    idx = 1
    for l in range(n_layers):
        in_dim = emb_dim if l == 0 else hid_dim
        # stored pre-transposed: (in_dim, 4H), (hid, 4H)
        params[f"w_ih_{l}"] = jax.random.uniform(
            keys[idx], (in_dim, 4 * hid_dim), jnp.float32, -k, k); idx += 1
        params[f"w_hh_{l}"] = jax.random.uniform(
            keys[idx], (hid_dim, 4 * hid_dim), jnp.float32, -k, k); idx += 1
        b_ih = jax.random.uniform(
            keys[idx], (4 * hid_dim,), jnp.float32, -k, k); idx += 1
        b_hh = jax.random.uniform(
            keys[idx], (4 * hid_dim,), jnp.float32, -k, k); idx += 1
        params[f"b_{l}"] = (b_ih + b_hh)[None, :]
    return params


if __name__ == "__main__":
    # Small shapes consistent with the module's forward:
    INPUT_DIM = 50      # vocab size
    EMB_DIM = 32
    HID_DIM = 32
    N_LAYERS = 2
    SEQ_LEN = 8
    BATCH = 2

    root = jax.random.PRNGKey(0)
    k_param, k_src = jax.random.split(root)
    params = init_params(k_param, INPUT_DIM, EMB_DIM, HID_DIM, N_LAYERS)
    src = jax.random.randint(k_src, (SEQ_LEN, BATCH), 0, INPUT_DIM, jnp.int32)

    fwd = jax.jit(functools.partial(encoder_forward, n_layers=N_LAYERS))
    hidden, cell = fwd(src, params)
    jax.block_until_ready((hidden, cell))

    # Correctness check vs pure-JAX reference.  Tolerance leaves headroom for
    # accumulation-order differences (hoisted / concatenated matmuls) between
    # the Mosaic and XLA f32 matmul paths.
    h_ref, c_ref = encoder_reference(src, params, N_LAYERS)
    assert hidden.shape == (N_LAYERS, BATCH, HID_DIM)
    assert cell.shape == (N_LAYERS, BATCH, HID_DIM)
    np.testing.assert_allclose(np.asarray(hidden), np.asarray(h_ref),
                               rtol=1e-4, atol=1e-4)
    np.testing.assert_allclose(np.asarray(cell), np.asarray(c_ref),
                               rtol=1e-4, atol=1e-4)

    print("KERNEL_OK")
</pallas_src>

<mosaic_0001>
module attributes {stable_mosaic.version = 11 : i64} {
  func.func @kernel(%arg0: memref<64x1xi32, #tpu.memory_space<vmem>>, %arg1: memref<50x32xf32, #tpu.memory_space<vmem>>, %arg2: memref<32x128xf32, #tpu.memory_space<vmem>>, %arg3: memref<32x128xf32, #tpu.memory_space<vmem>>, %arg4: memref<1x128xf32, #tpu.memory_space<vmem>>, %arg5: memref<64x128xf32, #tpu.memory_space<vmem>>, %arg6: memref<1x128xf32, #tpu.memory_space<vmem>>, %arg7: memref<2x8x32xf32, #tpu.memory_space<vmem>>, %arg8: memref<2x8x32xf32, #tpu.memory_space<vmem>>) attributes {dimension_semantics = [], scalar_prefetch = 0 : i64, scratch_operands = 0 : i64, tpu.core_type = #tpu.core_type<tc>} {
    %c0 = arith.constant 0 : index
    %c0_0 = arith.constant 0 : index
    %0 = vector.load %arg0[%c0, %c0_0] : memref<64x1xi32, #tpu.memory_space<vmem>>, vector<64x1xi32>
    %1 = tpu.iota {dimensions = array<i32: 1>} : vector<64x50xi32>
    %2 = vector.broadcast %0 : vector<64x1xi32> to vector<64x50xi32>
    %3 = arith.cmpi eq, %2, %1 : vector<64x50xi32>
    %4 = arith.extui %3 : vector<64x50xi1> to vector<64x50xi32>
    %5 = arith.sitofp %4 : vector<64x50xi32> to vector<64x50xf32>
    %c0_1 = arith.constant 0 : index
    %c0_2 = arith.constant 0 : index
    %6 = vector.load %arg1[%c0_1, %c0_2] : memref<50x32xf32, #tpu.memory_space<vmem>>, vector<50x32xf32>
    %cst = arith.constant dense<0.000000e+00> : vector<64x32xf32>
    %7 = tpu.matmul %5, %6, %cst {dimension_numbers = #tpu.dot_dimension_numbers<[1], [0], [0], [1], [0, 0, 1, 1], [], []>} : vector<64x50xf32>, vector<50x32xf32>, vector<64x32xf32> -> vector<64x32xf32>
    %c0_3 = arith.constant 0 : index
    %c0_4 = arith.constant 0 : index
    %8 = vector.load %arg2[%c0_3, %c0_4] : memref<32x128xf32, #tpu.memory_space<vmem>>, vector<32x128xf32>
    %cst_5 = arith.constant dense<0.000000e+00> : vector<64x128xf32>
    %9 = tpu.matmul %7, %8, %cst_5 {dimension_numbers = #tpu.dot_dimension_numbers<[1], [0], [0], [1], [0, 0, 1, 1], [], []>} : vector<64x32xf32>, vector<32x128xf32>, vector<64x128xf32> -> vector<64x128xf32>
    %c0_6 = arith.constant 0 : index
    %c0_7 = arith.constant 0 : index
    %10 = vector.load %arg4[%c0_6, %c0_7] : memref<1x128xf32, #tpu.memory_space<vmem>>, vector<1x128xf32>
    %11 = vector.broadcast %10 : vector<1x128xf32> to vector<64x128xf32>
    %12 = arith.addf %9, %11 : vector<64x128xf32>
    %c0_8 = arith.constant 0 : index
    %c0_9 = arith.constant 0 : index
    %13 = vector.load %arg3[%c0_8, %c0_9] : memref<32x128xf32, #tpu.memory_space<vmem>>, vector<32x128xf32>
    %c0_10 = arith.constant 0 : index
    %c0_11 = arith.constant 0 : index
    %14 = vector.load %arg5[%c0_10, %c0_11] : memref<64x128xf32, #tpu.memory_space<vmem>>, vector<64x128xf32>
    %c0_12 = arith.constant 0 : index
    %c0_13 = arith.constant 0 : index
    %15 = vector.load %arg6[%c0_12, %c0_13] : memref<1x128xf32, #tpu.memory_space<vmem>>, vector<1x128xf32>
    %cst_14 = arith.constant 0.000000e+00 : f32
    %16 = vector.broadcast %cst_14 : f32 to vector<8x32xf32>
    %cst_15 = arith.constant 0.000000e+00 : f32
    %17 = vector.broadcast %cst_15 : f32 to vector<8x32xf32>
    %cst_16 = arith.constant 0.000000e+00 : f32
    %18 = vector.broadcast %cst_16 : f32 to vector<8x32xf32>
    %cst_17 = arith.constant 0.000000e+00 : f32
    %19 = vector.broadcast %cst_17 : f32 to vector<8x32xf32>
    %20 = vector.extract_strided_slice %12 {offsets = [0, 0], sizes = [8, 128], strides = [1, 1]} : vector<64x128xf32> to vector<8x128xf32>
    %cst_18 = arith.constant dense<0.000000e+00> : vector<8x128xf32>
    %21 = tpu.matmul %16, %13, %cst_18 {dimension_numbers = #tpu.dot_dimension_numbers<[1], [0], [0], [1], [0, 0, 1, 1], [], []>} : vector<8x32xf32>, vector<32x128xf32>, vector<8x128xf32> -> vector<8x128xf32>
    %22 = arith.addf %20, %21 : vector<8x128xf32>
    %23 = arith.negf %22 : vector<8x128xf32>
    %24 = math.exp %23 : vector<8x128xf32>
    %cst_19 = arith.constant 1.000000e+00 : f32
    %25 = vector.broadcast %cst_19 : f32 to vector<8x128xf32>
    %26 = arith.addf %25, %24 : vector<8x128xf32>
    %27 = arith.divf %25, %26 : vector<8x128xf32>
    %28 = math.tanh %22 : vector<8x128xf32>
    %29 = vector.extract_strided_slice %27 {offsets = [0, 0], sizes = [8, 32], strides = [1, 1]} : vector<8x128xf32> to vector<8x32xf32>
    %30 = vector.extract_strided_slice %27 {offsets = [0, 32], sizes = [8, 32], strides = [1, 1]} : vector<8x128xf32> to vector<8x32xf32>
    %31 = vector.extract_strided_slice %28 {offsets = [0, 64], sizes = [8, 32], strides = [1, 1]} : vector<8x128xf32> to vector<8x32xf32>
    %32 = vector.extract_strided_slice %27 {offsets = [0, 96], sizes = [8, 32], strides = [1, 1]} : vector<8x128xf32> to vector<8x32xf32>
    %33 = arith.mulf %30, %18 : vector<8x32xf32>
    %34 = arith.mulf %29, %31 : vector<8x32xf32>
    %35 = arith.addf %33, %34 : vector<8x32xf32>
    %36 = math.tanh %35 : vector<8x32xf32>
    %37 = arith.mulf %32, %36 : vector<8x32xf32>
    %38 = vector.extract_strided_slice %12 {offsets = [8, 0], sizes = [8, 128], strides = [1, 1]} : vector<64x128xf32> to vector<8x128xf32>
    %cst_20 = arith.constant dense<0.000000e+00> : vector<8x128xf32>
    %39 = tpu.matmul %37, %13, %cst_20 {dimension_numbers = #tpu.dot_dimension_numbers<[1], [0], [0], [1], [0, 0, 1, 1], [], []>} : vector<8x32xf32>, vector<32x128xf32>, vector<8x128xf32> -> vector<8x128xf32>
    %40 = arith.addf %38, %39 : vector<8x128xf32>
    %41 = arith.negf %40 : vector<8x128xf32>
    %42 = math.exp %41 : vector<8x128xf32>
    %cst_21 = arith.constant 1.000000e+00 : f32
    %43 = vector.broadcast %cst_21 : f32 to vector<8x128xf32>
    %44 = arith.addf %43, %42 : vector<8x128xf32>
    %45 = arith.divf %43, %44 : vector<8x128xf32>
    %46 = math.tanh %40 : vector<8x128xf32>
    %47 = vector.extract_strided_slice %45 {offsets = [0, 0], sizes = [8, 32], strides = [1, 1]} : vector<8x128xf32> to vector<8x32xf32>
    %48 = vector.extract_strided_slice %45 {offsets = [0, 32], sizes = [8, 32], strides = [1, 1]} : vector<8x128xf32> to vector<8x32xf32>
    %49 = vector.extract_strided_slice %46 {offsets = [0, 64], sizes = [8, 32], strides = [1, 1]} : vector<8x128xf32> to vector<8x32xf32>
    %50 = vector.extract_strided_slice %45 {offsets = [0, 96], sizes = [8, 32], strides = [1, 1]} : vector<8x128xf32> to vector<8x32xf32>
    %51 = arith.mulf %48, %35 : vector<8x32xf32>
    %52 = arith.mulf %47, %49 : vector<8x32xf32>
    %53 = arith.addf %51, %52 : vector<8x32xf32>
    %54 = math.tanh %53 : vector<8x32xf32>
    %55 = arith.mulf %50, %54 : vector<8x32xf32>
    %56 = tpu.concatenate %37, %17 in 1 : vector<8x32xf32>, vector<8x32xf32> -> vector<8x64xf32>
    %cst_22 = arith.constant dense<0.000000e+00> : vector<8x128xf32>
    %57 = tpu.matmul %56, %14, %cst_22 {dimension_numbers = #tpu.dot_dimension_numbers<[1], [0], [0], [1], [0, 0, 1, 1], [], []>} : vector<8x64xf32>, vector<64x128xf32>, vector<8x128xf32> -> vector<8x128xf32>
    %58 = vector.broadcast %15 : vector<1x128xf32> to vector<8x128xf32>
    %59 = arith.addf %57, %58 : vector<8x128xf32>
    %60 = arith.negf %59 : vector<8x128xf32>
    %61 = math.exp %60 : vector<8x128xf32>
    %cst_23 = arith.constant 1.000000e+00 : f32
    %62 = vector.broadcast %cst_23 : f32 to vector<8x128xf32>
    %63 = arith.addf %62, %61 : vector<8x128xf32>
    %64 = arith.divf %62, %63 : vector<8x128xf32>
    %65 = math.tanh %59 : vector<8x128xf32>
    %66 = vector.extract_strided_slice %64 {offsets = [0, 0], sizes = [8, 32], strides = [1, 1]} : vector<8x128xf32> to vector<8x32xf32>
    %67 = vector.extract_strided_slice %64 {offsets = [0, 32], sizes = [8, 32], strides = [1, 1]} : vector<8x128xf32> to vector<8x32xf32>
    %68 = vector.extract_strided_slice %65 {offsets = [0, 64], sizes = [8, 32], strides = [1, 1]} : vector<8x128xf32> to vector<8x32xf32>
    %69 = vector.extract_strided_slice %64 {offsets = [0, 96], sizes = [8, 32], strides = [1, 1]} : vector<8x128xf32> to vector<8x32xf32>
    %70 = arith.mulf %67, %19 : vector<8x32xf32>
    %71 = arith.mulf %66, %68 : vector<8x32xf32>
    %72 = arith.addf %70, %71 : vector<8x32xf32>
    %73 = math.tanh %72 : vector<8x32xf32>
    %74 = arith.mulf %69, %73 : vector<8x32xf32>
    %75 = vector.extract_strided_slice %12 {offsets = [16, 0], sizes = [8, 128], strides = [1, 1]} : vector<64x128xf32> to vector<8x128xf32>
    %cst_24 = arith.constant dense<0.000000e+00> : vector<8x128xf32>
    %76 = tpu.matmul %55, %13, %cst_24 {dimension_numbers = #tpu.dot_dimension_numbers<[1], [0], [0], [1], [0, 0, 1, 1], [], []>} : vector<8x32xf32>, vector<32x128xf32>, vector<8x128xf32> -> vector<8x128xf32>
    %77 = arith.addf %75, %76 : vector<8x128xf32>
    %78 = arith.negf %77 : vector<8x128xf32>
    %79 = math.exp %78 : vector<8x128xf32>
    %cst_25 = arith.constant 1.000000e+00 : f32
    %80 = vector.broadcast %cst_25 : f32 to vector<8x128xf32>
    %81 = arith.addf %80, %79 : vector<8x128xf32>
    %82 = arith.divf %80, %81 : vector<8x128xf32>
    %83 = math.tanh %77 : vector<8x128xf32>
    %84 = vector.extract_strided_slice %82 {offsets = [0, 0], sizes = [8, 32], strides = [1, 1]} : vector<8x128xf32> to vector<8x32xf32>
    %85 = vector.extract_strided_slice %82 {offsets = [0, 32], sizes = [8, 32], strides = [1, 1]} : vector<8x128xf32> to vector<8x32xf32>
    %86 = vector.extract_strided_slice %83 {offsets = [0, 64], sizes = [8, 32], strides = [1, 1]} : vector<8x128xf32> to vector<8x32xf32>
    %87 = vector.extract_strided_slice %82 {offsets = [0, 96], sizes = [8, 32], strides = [1, 1]} : vector<8x128xf32> to vector<8x32xf32>
    %88 = arith.mulf %85, %53 : vector<8x32xf32>
    %89 = arith.mulf %84, %86 : vector<8x32xf32>
    %90 = arith.addf %88, %89 : vector<8x32xf32>
    %91 = math.tanh %90 : vector<8x32xf32>
    %92 = arith.mulf %87, %91 : vector<8x32xf32>
    %93 = tpu.concatenate %55, %74 in 1 : vector<8x32xf32>, vector<8x32xf32> -> vector<8x64xf32>
    %cst_26 = arith.constant dense<0.000000e+00> : vector<8x128xf32>
    %94 = tpu.matmul %93, %14, %cst_26 {dimension_numbers = #tpu.dot_dimension_numbers<[1], [0], [0], [1], [0, 0, 1, 1], [], []>} : vector<8x64xf32>, vector<64x128xf32>, vector<8x128xf32> -> vector<8x128xf32>
    %95 = vector.broadcast %15 : vector<1x128xf32> to vector<8x128xf32>
    %96 = arith.addf %94, %95 : vector<8x128xf32>
    %97 = arith.negf %96 : vector<8x128xf32>
    %98 = math.exp %97 : vector<8x128xf32>
    %cst_27 = arith.constant 1.000000e+00 : f32
    %99 = vector.broadcast %cst_27 : f32 to vector<8x128xf32>
    %100 = arith.addf %99, %98 : vector<8x128xf32>
    %101 = arith.divf %99, %100 : vector<8x128xf32>
    %102 = math.tanh %96 : vector<8x128xf32>
    %103 = vector.extract_strided_slice %101 {offsets = [0, 0], sizes = [8, 32], strides = [1, 1]} : vector<8x128xf32> to vector<8x32xf32>
    %104 = vector.extract_strided_slice %101 {offsets = [0, 32], sizes = [8, 32], strides = [1, 1]} : vector<8x128xf32> to vector<8x32xf32>
    %105 = vector.extract_strided_slice %102 {offsets = [0, 64], sizes = [8, 32], strides = [1, 1]} : vector<8x128xf32> to vector<8x32xf32>
    %106 = vector.extract_strided_slice %101 {offsets = [0, 96], sizes = [8, 32], strides = [1, 1]} : vector<8x128xf32> to vector<8x32xf32>
    %107 = arith.mulf %104, %72 : vector<8x32xf32>
    %108 = arith.mulf %103, %105 : vector<8x32xf32>
    %109 = arith.addf %107, %108 : vector<8x32xf32>
    %110 = math.tanh %109 : vector<8x32xf32>
    %111 = arith.mulf %106, %110 : vector<8x32xf32>
    %112 = vector.extract_strided_slice %12 {offsets = [24, 0], sizes = [8, 128], strides = [1, 1]} : vector<64x128xf32> to vector<8x128xf32>
    %cst_28 = arith.constant dense<0.000000e+00> : vector<8x128xf32>
    %113 = tpu.matmul %92, %13, %cst_28 {dimension_numbers = #tpu.dot_dimension_numbers<[1], [0], [0], [1], [0, 0, 1, 1], [], []>} : vector<8x32xf32>, vector<32x128xf32>, vector<8x128xf32> -> vector<8x128xf32>
    %114 = arith.addf %112, %113 : vector<8x128xf32>
    %115 = arith.negf %114 : vector<8x128xf32>
    %116 = math.exp %115 : vector<8x128xf32>
    %cst_29 = arith.constant 1.000000e+00 : f32
    %117 = vector.broadcast %cst_29 : f32 to vector<8x128xf32>
    %118 = arith.addf %117, %116 : vector<8x128xf32>
    %119 = arith.divf %117, %118 : vector<8x128xf32>
    %120 = math.tanh %114 : vector<8x128xf32>
    %121 = vector.extract_strided_slice %119 {offsets = [0, 0], sizes = [8, 32], strides = [1, 1]} : vector<8x128xf32> to vector<8x32xf32>
    %122 = vector.extract_strided_slice %119 {offsets = [0, 32], sizes = [8, 32], strides = [1, 1]} : vector<8x128xf32> to vector<8x32xf32>
    %123 = vector.extract_strided_slice %120 {offsets = [0, 64], sizes = [8, 32], strides = [1, 1]} : vector<8x128xf32> to vector<8x32xf32>
    %124 = vector.extract_strided_slice %119 {offsets = [0, 96], sizes = [8, 32], strides = [1, 1]} : vector<8x128xf32> to vector<8x32xf32>
    %125 = arith.mulf %122, %90 : vector<8x32xf32>
    %126 = arith.mulf %121, %123 : vector<8x32xf32>
    %127 = arith.addf %125, %126 : vector<8x32xf32>
    %128 = math.tanh %127 : vector<8x32xf32>
    %129 = arith.mulf %124, %128 : vector<8x32xf32>
    %130 = tpu.concatenate %92, %111 in 1 : vector<8x32xf32>, vector<8x32xf32> -> vector<8x64xf32>
    %cst_30 = arith.constant dense<0.000000e+00> : vector<8x128xf32>
    %131 = tpu.matmul %130, %14, %cst_30 {dimension_numbers = #tpu.dot_dimension_numbers<[1], [0], [0], [1], [0, 0, 1, 1], [], []>} : vector<8x64xf32>, vector<64x128xf32>, vector<8x128xf32> -> vector<8x128xf32>
    %132 = vector.broadcast %15 : vector<1x128xf32> to vector<8x128xf32>
    %133 = arith.addf %131, %132 : vector<8x128xf32>
    %134 = arith.negf %133 : vector<8x128xf32>
    %135 = math.exp %134 : vector<8x128xf32>
    %cst_31 = arith.constant 1.000000e+00 : f32
    %136 = vector.broadcast %cst_31 : f32 to vector<8x128xf32>
    %137 = arith.addf %136, %135 : vector<8x128xf32>
    %138 = arith.divf %136, %137 : vector<8x128xf32>
    %139 = math.tanh %133 : vector<8x128xf32>
    %140 = vector.extract_strided_slice %138 {offsets = [0, 0], sizes = [8, 32], strides = [1, 1]} : vector<8x128xf32> to vector<8x32xf32>
    %141 = vector.extract_strided_slice %138 {offsets = [0, 32], sizes = [8, 32], strides = [1, 1]} : vector<8x128xf32> to vector<8x32xf32>
    %142 = vector.extract_strided_slice %139 {offsets = [0, 64], sizes = [8, 32], strides = [1, 1]} : vector<8x128xf32> to vector<8x32xf32>
    %143 = vector.extract_strided_slice %138 {offsets = [0, 96], sizes = [8, 32], strides = [1, 1]} : vector<8x128xf32> to vector<8x32xf32>
    %144 = arith.mulf %141, %109 : vector<8x32xf32>
    %145 = arith.mulf %140, %142 : vector<8x32xf32>
    %146 = arith.addf %144, %145 : vector<8x32xf32>
    %147 = math.tanh %146 : vector<8x32xf32>
    %148 = arith.mulf %143, %147 : vector<8x32xf32>
    %149 = vector.extract_strided_slice %12 {offsets = [32, 0], sizes = [8, 128], strides = [1, 1]} : vector<64x128xf32> to vector<8x128xf32>
    %cst_32 = arith.constant dense<0.000000e+00> : vector<8x128xf32>
    %150 = tpu.matmul %129, %13, %cst_32 {dimension_numbers = #tpu.dot_dimension_numbers<[1], [0], [0], [1], [0, 0, 1, 1], [], []>} : vector<8x32xf32>, vector<32x128xf32>, vector<8x128xf32> -> vector<8x128xf32>
    %151 = arith.addf %149, %150 : vector<8x128xf32>
    %152 = arith.negf %151 : vector<8x128xf32>
    %153 = math.exp %152 : vector<8x128xf32>
    %cst_33 = arith.constant 1.000000e+00 : f32
    %154 = vector.broadcast %cst_33 : f32 to vector<8x128xf32>
    %155 = arith.addf %154, %153 : vector<8x128xf32>
    %156 = arith.divf %154, %155 : vector<8x128xf32>
    %157 = math.tanh %151 : vector<8x128xf32>
    %158 = vector.extract_strided_slice %156 {offsets = [0, 0], sizes = [8, 32], strides = [1, 1]} : vector<8x128xf32> to vector<8x32xf32>
    %159 = vector.extract_strided_slice %156 {offsets = [0, 32], sizes = [8, 32], strides = [1, 1]} : vector<8x128xf32> to vector<8x32xf32>
    %160 = vector.extract_strided_slice %157 {offsets = [0, 64], sizes = [8, 32], strides = [1, 1]} : vector<8x128xf32> to vector<8x32xf32>
    %161 = vector.extract_strided_slice %156 {offsets = [0, 96], sizes = [8, 32], strides = [1, 1]} : vector<8x128xf32> to vector<8x32xf32>
    %162 = arith.mulf %159, %127 : vector<8x32xf32>
    %163 = arith.mulf %158, %160 : vector<8x32xf32>
    %164 = arith.addf %162, %163 : vector<8x32xf32>
    %165 = math.tanh %164 : vector<8x32xf32>
    %166 = arith.mulf %161, %165 : vector<8x32xf32>
    %167 = tpu.concatenate %129, %148 in 1 : vector<8x32xf32>, vector<8x32xf32> -> vector<8x64xf32>
    %cst_34 = arith.constant dense<0.000000e+00> : vector<8x128xf32>
    %168 = tpu.matmul %167, %14, %cst_34 {dimension_numbers = #tpu.dot_dimension_numbers<[1], [0], [0], [1], [0, 0, 1, 1], [], []>} : vector<8x64xf32>, vector<64x128xf32>, vector<8x128xf32> -> vector<8x128xf32>
    %169 = vector.broadcast %15 : vector<1x128xf32> to vector<8x128xf32>
    %170 = arith.addf %168, %169 : vector<8x128xf32>
    %171 = arith.negf %170 : vector<8x128xf32>
    %172 = math.exp %171 : vector<8x128xf32>
    %cst_35 = arith.constant 1.000000e+00 : f32
    %173 = vector.broadcast %cst_35 : f32 to vector<8x128xf32>
    %174 = arith.addf %173, %172 : vector<8x128xf32>
    %175 = arith.divf %173, %174 : vector<8x128xf32>
    %176 = math.tanh %170 : vector<8x128xf32>
    %177 = vector.extract_strided_slice %175 {offsets = [0, 0], sizes = [8, 32], strides = [1, 1]} : vector<8x128xf32> to vector<8x32xf32>
    %178 = vector.extract_strided_slice %175 {offsets = [0, 32], sizes = [8, 32], strides = [1, 1]} : vector<8x128xf32> to vector<8x32xf32>
    %179 = vector.extract_strided_slice %176 {offsets = [0, 64], sizes = [8, 32], strides = [1, 1]} : vector<8x128xf32> to vector<8x32xf32>
    %180 = vector.extract_strided_slice %175 {offsets = [0, 96], sizes = [8, 32], strides = [1, 1]} : vector<8x128xf32> to vector<8x32xf32>
    %181 = arith.mulf %178, %146 : vector<8x32xf32>
    %182 = arith.mulf %177, %179 : vector<8x32xf32>
    %183 = arith.addf %181, %182 : vector<8x32xf32>
    %184 = math.tanh %183 : vector<8x32xf32>
    %185 = arith.mulf %180, %184 : vector<8x32xf32>
    %186 = vector.extract_strided_slice %12 {offsets = [40, 0], sizes = [8, 128], strides = [1, 1]} : vector<64x128xf32> to vector<8x128xf32>
    %cst_36 = arith.constant dense<0.000000e+00> : vector<8x128xf32>
    %187 = tpu.matmul %166, %13, %cst_36 {dimension_numbers = #tpu.dot_dimension_numbers<[1], [0], [0], [1], [0, 0, 1, 1], [], []>} : vector<8x32xf32>, vector<32x128xf32>, vector<8x128xf32> -> vector<8x128xf32>
    %188 = arith.addf %186, %187 : vector<8x128xf32>
    %189 = arith.negf %188 : vector<8x128xf32>
    %190 = math.exp %189 : vector<8x128xf32>
    %cst_37 = arith.constant 1.000000e+00 : f32
    %191 = vector.broadcast %cst_37 : f32 to vector<8x128xf32>
    %192 = arith.addf %191, %190 : vector<8x128xf32>
    %193 = arith.divf %191, %192 : vector<8x128xf32>
    %194 = math.tanh %188 : vector<8x128xf32>
    %195 = vector.extract_strided_slice %193 {offsets = [0, 0], sizes = [8, 32], strides = [1, 1]} : vector<8x128xf32> to vector<8x32xf32>
    %196 = vector.extract_strided_slice %193 {offsets = [0, 32], sizes = [8, 32], strides = [1, 1]} : vector<8x128xf32> to vector<8x32xf32>
    %197 = vector.extract_strided_slice %194 {offsets = [0, 64], sizes = [8, 32], strides = [1, 1]} : vector<8x128xf32> to vector<8x32xf32>
    %198 = vector.extract_strided_slice %193 {offsets = [0, 96], sizes = [8, 32], strides = [1, 1]} : vector<8x128xf32> to vector<8x32xf32>
    %199 = arith.mulf %196, %164 : vector<8x32xf32>
    %200 = arith.mulf %195, %197 : vector<8x32xf32>
    %201 = arith.addf %199, %200 : vector<8x32xf32>
    %202 = math.tanh %201 : vector<8x32xf32>
    %203 = arith.mulf %198, %202 : vector<8x32xf32>
    %204 = tpu.concatenate %166, %185 in 1 : vector<8x32xf32>, vector<8x32xf32> -> vector<8x64xf32>
    %cst_38 = arith.constant dense<0.000000e+00> : vector<8x128xf32>
    %205 = tpu.matmul %204, %14, %cst_38 {dimension_numbers = #tpu.dot_dimension_numbers<[1], [0], [0], [1], [0, 0, 1, 1], [], []>} : vector<8x64xf32>, vector<64x128xf32>, vector<8x128xf32> -> vector<8x128xf32>
    %206 = vector.broadcast %15 : vector<1x128xf32> to vector<8x128xf32>
    %207 = arith.addf %205, %206 : vector<8x128xf32>
    %208 = arith.negf %207 : vector<8x128xf32>
    %209 = math.exp %208 : vector<8x128xf32>
    %cst_39 = arith.constant 1.000000e+00 : f32
    %210 = vector.broadcast %cst_39 : f32 to vector<8x128xf32>
    %211 = arith.addf %210, %209 : vector<8x128xf32>
    %212 = arith.divf %210, %211 : vector<8x128xf32>
    %213 = math.tanh %207 : vector<8x128xf32>
    %214 = vector.extract_strided_slice %212 {offsets = [0, 0], sizes = [8, 32], strides = [1, 1]} : vector<8x128xf32> to vector<8x32xf32>
    %215 = vector.extract_strided_slice %212 {offsets = [0, 32], sizes = [8, 32], strides = [1, 1]} : vector<8x128xf32> to vector<8x32xf32>
    %216 = vector.extract_strided_slice %213 {offsets = [0, 64], sizes = [8, 32], strides = [1, 1]} : vector<8x128xf32> to vector<8x32xf32>
    %217 = vector.extract_strided_slice %212 {offsets = [0, 96], sizes = [8, 32], strides = [1, 1]} : vector<8x128xf32> to vector<8x32xf32>
    %218 = arith.mulf %215, %183 : vector<8x32xf32>
    %219 = arith.mulf %214, %216 : vector<8x32xf32>
    %220 = arith.addf %218, %219 : vector<8x32xf32>
    %221 = math.tanh %220 : vector<8x32xf32>
    %222 = arith.mulf %217, %221 : vector<8x32xf32>
    %223 = vector.extract_strided_slice %12 {offsets = [48, 0], sizes = [8, 128], strides = [1, 1]} : vector<64x128xf32> to vector<8x128xf32>
    %cst_40 = arith.constant dense<0.000000e+00> : vector<8x128xf32>
    %224 = tpu.matmul %203, %13, %cst_40 {dimension_numbers = #tpu.dot_dimension_numbers<[1], [0], [0], [1], [0, 0, 1, 1], [], []>} : vector<8x32xf32>, vector<32x128xf32>, vector<8x128xf32> -> vector<8x128xf32>
    %225 = arith.addf %223, %224 : vector<8x128xf32>
    %226 = arith.negf %225 : vector<8x128xf32>
    %227 = math.exp %226 : vector<8x128xf32>
    %cst_41 = arith.constant 1.000000e+00 : f32
    %228 = vector.broadcast %cst_41 : f32 to vector<8x128xf32>
    %229 = arith.addf %228, %227 : vector<8x128xf32>
    %230 = arith.divf %228, %229 : vector<8x128xf32>
    %231 = math.tanh %225 : vector<8x128xf32>
    %232 = vector.extract_strided_slice %230 {offsets = [0, 0], sizes = [8, 32], strides = [1, 1]} : vector<8x128xf32> to vector<8x32xf32>
    %233 = vector.extract_strided_slice %230 {offsets = [0, 32], sizes = [8, 32], strides = [1, 1]} : vector<8x128xf32> to vector<8x32xf32>
    %234 = vector.extract_strided_slice %231 {offsets = [0, 64], sizes = [8, 32], strides = [1, 1]} : vector<8x128xf32> to vector<8x32xf32>
    %235 = vector.extract_strided_slice %230 {offsets = [0, 96], sizes = [8, 32], strides = [1, 1]} : vector<8x128xf32> to vector<8x32xf32>
    %236 = arith.mulf %233, %201 : vector<8x32xf32>
    %237 = arith.mulf %232, %234 : vector<8x32xf32>
    %238 = arith.addf %236, %237 : vector<8x32xf32>
    %239 = math.tanh %238 : vector<8x32xf32>
    %240 = arith.mulf %235, %239 : vector<8x32xf32>
    %241 = tpu.concatenate %203, %222 in 1 : vector<8x32xf32>, vector<8x32xf32> -> vector<8x64xf32>
    %cst_42 = arith.constant dense<0.000000e+00> : vector<8x128xf32>
    %242 = tpu.matmul %241, %14, %cst_42 {dimension_numbers = #tpu.dot_dimension_numbers<[1], [0], [0], [1], [0, 0, 1, 1], [], []>} : vector<8x64xf32>, vector<64x128xf32>, vector<8x128xf32> -> vector<8x128xf32>
    %243 = vector.broadcast %15 : vector<1x128xf32> to vector<8x128xf32>
    %244 = arith.addf %242, %243 : vector<8x128xf32>
    %245 = arith.negf %244 : vector<8x128xf32>
    %246 = math.exp %245 : vector<8x128xf32>
    %cst_43 = arith.constant 1.000000e+00 : f32
    %247 = vector.broadcast %cst_43 : f32 to vector<8x128xf32>
    %248 = arith.addf %247, %246 : vector<8x128xf32>
    %249 = arith.divf %247, %248 : vector<8x128xf32>
    %250 = math.tanh %244 : vector<8x128xf32>
    %251 = vector.extract_strided_slice %249 {offsets = [0, 0], sizes = [8, 32], strides = [1, 1]} : vector<8x128xf32> to vector<8x32xf32>
    %252 = vector.extract_strided_slice %249 {offsets = [0, 32], sizes = [8, 32], strides = [1, 1]} : vector<8x128xf32> to vector<8x32xf32>
    %253 = vector.extract_strided_slice %250 {offsets = [0, 64], sizes = [8, 32], strides = [1, 1]} : vector<8x128xf32> to vector<8x32xf32>
    %254 = vector.extract_strided_slice %249 {offsets = [0, 96], sizes = [8, 32], strides = [1, 1]} : vector<8x128xf32> to vector<8x32xf32>
    %255 = arith.mulf %252, %220 : vector<8x32xf32>
    %256 = arith.mulf %251, %253 : vector<8x32xf32>
    %257 = arith.addf %255, %256 : vector<8x32xf32>
    %258 = math.tanh %257 : vector<8x32xf32>
    %259 = arith.mulf %254, %258 : vector<8x32xf32>
    %260 = vector.extract_strided_slice %12 {offsets = [56, 0], sizes = [8, 128], strides = [1, 1]} : vector<64x128xf32> to vector<8x128xf32>
    %cst_44 = arith.constant dense<0.000000e+00> : vector<8x128xf32>
    %261 = tpu.matmul %240, %13, %cst_44 {dimension_numbers = #tpu.dot_dimension_numbers<[1], [0], [0], [1], [0, 0, 1, 1], [], []>} : vector<8x32xf32>, vector<32x128xf32>, vector<8x128xf32> -> vector<8x128xf32>
    %262 = arith.addf %260, %261 : vector<8x128xf32>
    %263 = arith.negf %262 : vector<8x128xf32>
    %264 = math.exp %263 : vector<8x128xf32>
    %cst_45 = arith.constant 1.000000e+00 : f32
    %265 = vector.broadcast %cst_45 : f32 to vector<8x128xf32>
    %266 = arith.addf %265, %264 : vector<8x128xf32>
    %267 = arith.divf %265, %266 : vector<8x128xf32>
    %268 = math.tanh %262 : vector<8x128xf32>
    %269 = vector.extract_strided_slice %267 {offsets = [0, 0], sizes = [8, 32], strides = [1, 1]} : vector<8x128xf32> to vector<8x32xf32>
    %270 = vector.extract_strided_slice %267 {offsets = [0, 32], sizes = [8, 32], strides = [1, 1]} : vector<8x128xf32> to vector<8x32xf32>
    %271 = vector.extract_strided_slice %268 {offsets = [0, 64], sizes = [8, 32], strides = [1, 1]} : vector<8x128xf32> to vector<8x32xf32>
    %272 = vector.extract_strided_slice %267 {offsets = [0, 96], sizes = [8, 32], strides = [1, 1]} : vector<8x128xf32> to vector<8x32xf32>
    %273 = arith.mulf %270, %238 : vector<8x32xf32>
    %274 = arith.mulf %269, %271 : vector<8x32xf32>
    %275 = arith.addf %273, %274 : vector<8x32xf32>
    %276 = math.tanh %275 : vector<8x32xf32>
    %277 = arith.mulf %272, %276 : vector<8x32xf32>
    %278 = tpu.concatenate %240, %259 in 1 : vector<8x32xf32>, vector<8x32xf32> -> vector<8x64xf32>
    %cst_46 = arith.constant dense<0.000000e+00> : vector<8x128xf32>
    %279 = tpu.matmul %278, %14, %cst_46 {dimension_numbers = #tpu.dot_dimension_numbers<[1], [0], [0], [1], [0, 0, 1, 1], [], []>} : vector<8x64xf32>, vector<64x128xf32>, vector<8x128xf32> -> vector<8x128xf32>
    %280 = vector.broadcast %15 : vector<1x128xf32> to vector<8x128xf32>
    %281 = arith.addf %279, %280 : vector<8x128xf32>
    %282 = arith.negf %281 : vector<8x128xf32>
    %283 = math.exp %282 : vector<8x128xf32>
    %cst_47 = arith.constant 1.000000e+00 : f32
    %284 = vector.broadcast %cst_47 : f32 to vector<8x128xf32>
    %285 = arith.addf %284, %283 : vector<8x128xf32>
    %286 = arith.divf %284, %285 : vector<8x128xf32>
    %287 = math.tanh %281 : vector<8x128xf32>
    %288 = vector.extract_strided_slice %286 {offsets = [0, 0], sizes = [8, 32], strides = [1, 1]} : vector<8x128xf32> to vector<8x32xf32>
    %289 = vector.extract_strided_slice %286 {offsets = [0, 32], sizes = [8, 32], strides = [1, 1]} : vector<8x128xf32> to vector<8x32xf32>
    %290 = vector.extract_strided_slice %287 {offsets = [0, 64], sizes = [8, 32], strides = [1, 1]} : vector<8x128xf32> to vector<8x32xf32>
    %291 = vector.extract_strided_slice %286 {offsets = [0, 96], sizes = [8, 32], strides = [1, 1]} : vector<8x128xf32> to vector<8x32xf32>
    %292 = arith.mulf %289, %257 : vector<8x32xf32>
    %293 = arith.mulf %288, %290 : vector<8x32xf32>
    %294 = arith.addf %292, %293 : vector<8x32xf32>
    %295 = math.tanh %294 : vector<8x32xf32>
    %296 = arith.mulf %291, %295 : vector<8x32xf32>
    %297 = tpu.concatenate %277, %296 in 1 : vector<8x32xf32>, vector<8x32xf32> -> vector<8x64xf32>
    %cst_48 = arith.constant dense<0.000000e+00> : vector<8x128xf32>
    %298 = tpu.matmul %297, %14, %cst_48 {dimension_numbers = #tpu.dot_dimension_numbers<[1], [0], [0], [1], [0, 0, 1, 1], [], []>} : vector<8x64xf32>, vector<64x128xf32>, vector<8x128xf32> -> vector<8x128xf32>
    %299 = vector.broadcast %15 : vector<1x128xf32> to vector<8x128xf32>
    %300 = arith.addf %298, %299 : vector<8x128xf32>
    %301 = arith.negf %300 : vector<8x128xf32>
    %302 = math.exp %301 : vector<8x128xf32>
    %cst_49 = arith.constant 1.000000e+00 : f32
    %303 = vector.broadcast %cst_49 : f32 to vector<8x128xf32>
    %304 = arith.addf %303, %302 : vector<8x128xf32>
    %305 = arith.divf %303, %304 : vector<8x128xf32>
    %306 = math.tanh %300 : vector<8x128xf32>
    %307 = vector.extract_strided_slice %305 {offsets = [0, 0], sizes = [8, 32], strides = [1, 1]} : vector<8x128xf32> to vector<8x32xf32>
    %308 = vector.extract_strided_slice %305 {offsets = [0, 32], sizes = [8, 32], strides = [1, 1]} : vector<8x128xf32> to vector<8x32xf32>
    %309 = vector.extract_strided_slice %306 {offsets = [0, 64], sizes = [8, 32], strides = [1, 1]} : vector<8x128xf32> to vector<8x32xf32>
    %310 = vector.extract_strided_slice %305 {offsets = [0, 96], sizes = [8, 32], strides = [1, 1]} : vector<8x128xf32> to vector<8x32xf32>
    %311 = arith.mulf %308, %294 : vector<8x32xf32>
    %312 = arith.mulf %307, %309 : vector<8x32xf32>
    %313 = arith.addf %311, %312 : vector<8x32xf32>
    %314 = math.tanh %313 : vector<8x32xf32>
    %315 = arith.mulf %310, %314 : vector<8x32xf32>
    %c0_50 = arith.constant 0 : index
    %c0_51 = arith.constant 0 : index
    %c0_52 = arith.constant 0 : index
    %316 = vector.load %arg7[%c0_50, %c0_51, %c0_52] : memref<2x8x32xf32, #tpu.memory_space<vmem>>, vector<1x8x32xf32>
    %317 = vector.shape_cast %316 : vector<1x8x32xf32> to vector<8x32xf32>
    %318 = vector.shape_cast %277 : vector<8x32xf32> to vector<1x8x32xf32>
    tpu.vector_store %arg7[%c0_50, %c0_51, %c0_52], %318 {strides = array<i32>} : memref<2x8x32xf32, #tpu.memory_space<vmem>>, vector<1x8x32xf32>,
    %c0_53 = arith.constant 0 : index
    %c0_54 = arith.constant 0 : index
    %c0_55 = arith.constant 0 : index
    %319 = vector.load %arg8[%c0_53, %c0_54, %c0_55] : memref<2x8x32xf32, #tpu.memory_space<vmem>>, vector<1x8x32xf32>
    %320 = vector.shape_cast %319 : vector<1x8x32xf32> to vector<8x32xf32>
    %321 = vector.shape_cast %275 : vector<8x32xf32> to vector<1x8x32xf32>
    tpu.vector_store %arg8[%c0_53, %c0_54, %c0_55], %321 {strides = array<i32>} : memref<2x8x32xf32, #tpu.memory_space<vmem>>, vector<1x8x32xf32>,
    %c1 = arith.constant 1 : index
    %c0_56 = arith.constant 0 : index
    %c0_57 = arith.constant 0 : index
    %322 = vector.load %arg7[%c1, %c0_56, %c0_57] : memref<2x8x32xf32, #tpu.memory_space<vmem>>, vector<1x8x32xf32>
    %323 = vector.shape_cast %322 : vector<1x8x32xf32> to vector<8x32xf32>
    %324 = vector.shape_cast %315 : vector<8x32xf32> to vector<1x8x32xf32>
    tpu.vector_store %arg7[%c1, %c0_56, %c0_57], %324 {strides = array<i32>} : memref<2x8x32xf32, #tpu.memory_space<vmem>>, vector<1x8x32xf32>,
    %c1_58 = arith.constant 1 : index
    %c0_59 = arith.constant 0 : index
    %c0_60 = arith.constant 0 : index
    %325 = vector.load %arg8[%c1_58, %c0_59, %c0_60] : memref<2x8x32xf32, #tpu.memory_space<vmem>>, vector<1x8x32xf32>
    %326 = vector.shape_cast %325 : vector<1x8x32xf32> to vector<8x32xf32>
    %327 = vector.shape_cast %313 : vector<8x32xf32> to vector<1x8x32xf32>
    tpu.vector_store %arg8[%c1_58, %c0_59, %c0_60], %327 {strides = array<i32>} : memref<2x8x32xf32, #tpu.memory_space<vmem>>, vector<1x8x32xf32>,
    return
  }
}

</mosaic_0001>

<bundles_post_ra>
// kernel: encoder_forward.1
= control target key start
LH: loop header
LB: loop body
LE: loop exit
PB: predicated region body
PF: predicated region fallthrough
CT: control target
= control target key end

     0   :  { %v1511_v0 = vmov 0   ;;  %vm118_vm0 = vcmask 1041408   ;;  %v36_v16 = vlaneseq  ;;  %vm93_vm1 = vcmask 408576   ;;  %s1513_s27 = smov 64   ;;  %s1514_s28 = smov 32   ;;  %s1992_s0 = inlined_call_operand.vmem [shape: s32[64,1], index: 0, kind: input, shape index: {}]   ;;  %s1993_s1 = inlined_call_operand.vmem [shape: f32[50,32], index: 1, kind: input, shape index: {}]   ;;  %s1994_s2 = inlined_call_operand.vmem [shape: f32[32,128], index: 2, kind: input, shape index: {}]   ;;  %s1995_s4 = inlined_call_operand.vmem [shape: f32[1,128], index: 4, kind: input, shape index: {}]   ;;  %s1996_s3 = inlined_call_operand.vmem [shape: f32[32,128], index: 3, kind: input, shape index: {}]   ;;  %s1997_s5 = inlined_call_operand.vmem [shape: f32[64,128], index: 5, kind: input, shape index: {}]   ;;  %s1998_s6 = inlined_call_operand.vmem [shape: f32[1,128], index: 6, kind: input, shape index: {}]   ;;  %s1999_s7 = inlined_call_operand.vmem [shape: f32[2,8,32], index: 7, kind: output, shape index: {0}]   ;;  %s2000_s8 = inlined_call_operand.vmem [shape: f32[2,8,32], index: 8, kind: output, shape index: {1}]  }
   0x1   :  { %1377 = vset.pattern.permute.xlu1 %v1511_v0  ;;  %1376 = vset.pattern.permute.xlu0 %v1511_v0  ;;  %v30_v1 = vld [vmem:[%s1992_s0 + $0x10] sm:$0xff]  ;;  %v28_v2 = vld [vmem:[%s1992_s0] sm:$0xff]  ;;  %v91_v5 = vld [vmem:[%s1993_s1 + $0x28] sm:$0xff]  ;;  %v1512_v19 = vmov 0.0   ;;  %vm171_vm10 = vcmask 261120   ;;  %vm379_vm15 = vcmask 523264  }
   0x2   :  { %45 = vperm.xlu1 %1377, %v30_v1   ;;  %39 = vperm.xlu0 %1376, %v28_v2   ;;  %v32_v3 = vld [vmem:[%s1992_s0 + $0x20] sm:$0xff]  ;;  %v92_v4 = vld [vmem:[%s1993_s1 + $0x30] sm:$0x3]  ;;  %v31_v7 = vld [vmem:[%s1992_s0 + $0x18] sm:$0xff]  ;;  %v37_v17 = vand.u32 127, %v36_v16 }
   0x3   :  { %1378 = vset.pattern.permute.xlu2 %v1511_v0  ;;  %1317 = vmatpush.msk.msra.mxu0 %vm118_vm0, %v92_v4  ;;  %v90_v6 = vld [vmem:[%s1993_s1 + $0x20] sm:$0xff]  ;;  %v29_v8 = vld [vmem:[%s1992_s0 + $0x8] sm:$0xff]  ;;  %v89_v9 = vld [vmem:[%s1993_s1 + $0x18] sm:$0xff] }
   0x4   :  { %51 = vperm.xlu2 %1378, %v32_v3   ;;  %v33_v10 = vld [vmem:[%s1992_s0 + $0x28] sm:$0xff]  ;;  %v88_v11 = vld [vmem:[%s1993_s1 + $0x10] sm:$0xff]  ;;  %v35_v13 = vld [vmem:[%s1992_s0 + $0x38] sm:$0xff] }
   0x5   :  { %132 = vmatpush.msra.mxu0 %v91_v5  ;;  %v87_v12 = vld [vmem:[%s1993_s1 + $0x8] sm:$0xff]  ;;  %v34_v14 = vld [vmem:[%s1992_s0 + $0x30] sm:$0xff]  ;;  %v86_v15 = vld [vmem:[%s1993_s1] sm:$0xff] }
   0x6   :  { %v166_v28 = vld [vmem:[%s1994_s2 + $0x18] sm:$0xff]  ;;  %v165_v29 = vld [vmem:[%s1994_s2 + $0x10] sm:$0xff]  ;;  %v164_v30 = vld [vmem:[%s1994_s2 + $0x8] sm:$0xff] }
   0x7   :  { %133 = vmatpush.msra.mxu0 %v90_v6  ;;  %208 = vmatpush.msra.mxu1 %v166_v28  ;;  %v163_v38 = vld [vmem:[%s1994_s2] sm:$0xff]  ;;  %v1641_v43 = vld [vmem:[%s1996_s3 + $0x18] sm:$0xff]  ;;  %v1646_v44 = vld [vmem:[%s1996_s3 + $0x10] sm:$0xff] }
   0x8   :  { %1367 = vmatpush.msra.mxu2 %v166_v28  ;;  %328 = vmatpush.msra.mxu3 %v1641_v43  ;;  %v1653_v45 = vld [vmem:[%s1996_s3 + $0x8] sm:$0xff]  ;;  %v1660_v46 = vld [vmem:[%s1996_s3] sm:$0xff]  ;;  %s1515_s3 = smov 96  }
   0x9   :  { %134 = vmatpush.msra.mxu0 %v89_v9  ;;  %209 = vmatpush.msra.mxu1 %v165_v29  ;;  %v1678_v51 = vld [vmem:[%s1995_s4] ss:$0 sm:$0xff]  ;;  %v1705_v16 = vld [vmem:[%s1997_s5 + $0x28] sm:$0xff] }
   0xa   :  { %48 = vperm.xlu1 %1377, %v31_v7   ;;  %42 = vperm.xlu0 %1376, %v29_v8  }
   0xb   :  { %135 = vmatpush.msra.mxu0 %v88_v11  ;;  %1368 = vmatpush.msra.mxu2 %v165_v29 }
   0xc   :  { %54 = vperm.xlu2 %1378, %v33_v10   ;;  %210 = vmatpush.msra.mxu1 %v164_v30 }
   0xd   :  { %136 = vmatpush.msra.mxu0 %v87_v12  ;;  %1369 = vmatpush.msra.mxu2 %v164_v30 }
   0xe   :  { %211 = vmatpush.msra.mxu1 %v163_v38  ;;  %329 = vmatpush.msra.mxu3 %v1646_v44 }
   0xf   :  { %137 = vmatpush.msra.mxu0 %v86_v15  ;;  %1370 = vmatpush.msra.mxu2 %v163_v38  ;;  %v1698_v15 = vld [vmem:[%s1997_s5 + $0x30] sm:$0xff] }
  0x10   :  { %330 = vmatpush.msra.mxu3 %v1653_v45 }
  0x11   :  { %265 = vmatpush.msrb.mxu2 %v1641_v43 }
  0x12   :  { %60 = vperm.xlu1 %1377, %v35_v13   ;;  %57 = vperm.xlu0 %1376, %v34_v14   ;;  %v1693_v14 = vld [vmem:[%s1997_s5 + $0x38] sm:$0xff] }
  0x13   :  { %266 = vmatpush.msrb.mxu2 %v1646_v44  ;;  %331 = vmatpush.msra.mxu3 %v1660_v46 }
  0x14   :  { %907 = vmatpush.msrb.mxu1 %v1693_v14  ;;  %1165 = vmatpush.msrb.mxu0 %v1693_v14 }
  0x15   :  { %267 = vmatpush.msrb.mxu2 %v1653_v45  ;;  %457 = vmatpush.msrb.mxu3 %v1641_v43 }
  0x16   :  { %908 = vmatpush.msrb.mxu1 %v1698_v15  ;;  %1166 = vmatpush.msrb.mxu0 %v1698_v15 }
  0x17   :  { %268 = vmatpush.msrb.mxu2 %v1660_v46  ;;  %458 = vmatpush.msrb.mxu3 %v1646_v44 }
  0x18   :  { %909 = vmatpush.msrb.mxu1 %v1705_v16  ;;  %1167 = vmatpush.msrb.mxu0 %v1705_v16 }
  0x19   :  { %459 = vmatpush.msrb.mxu3 %v1653_v45 }
  0x1b   :  { %460 = vmatpush.msrb.mxu3 %v1660_v46 }
  0x5e   :  { %v52_v27 = vpop.permute.xlu2 %51 }
  0x5f   :  { %vm66_vm6 = vcmp.eq.s32.totalorder %v52_v27, %v37_v17  ;;  %v1789_v27 = vld [vmem:[%s1998_s6] ss:$0 sm:$0xff] }
  0x60   :  { %v1313_v31 = vsel %vm66_vm6, 1.0, %v1512_v19 }
  0x66   :  { %v55_v32 = vpop.permute.xlu2 %54 }
  0x67   :  { %vm67_vm7 = vcmp.eq.s32.totalorder %v55_v32, %v37_v17 }
  0x68   :  { %v1314_v33 = vsel %vm67_vm7, 1.0, %v1512_v19 }
  0x74   :  { %v40_v18 = vpop.permute.xlu0 %39  ;;  %v46_v23 = vpop.permute.xlu1 %45 }
  0x75   :  { %vm62_vm2 = vcmp.eq.s32.totalorder %v40_v18, %v37_v17  ;;  %vm64_vm4 = vcmp.eq.s32.totalorder %v46_v23, %v37_v17  ;;  %v1721_v18 = vld [vmem:[%s1997_s5 + $0x18] sm:$0xff]  ;;  %v1750_v23 = vld [vmem:[%s1997_s5] sm:$0xff] }
  0x76   :  { %v1309_v20 = vsel %vm62_vm2, 1.0, %v1512_v19  ;;  %v1311_v24 = vsel %vm64_vm4, 1.0, %v1512_v19 }
  0x77   :  { %1318 = vmatmul.msk.f32.vlgmr.msra.gmra.mxu0 %vm93_vm1, %v1309_v20  ;;  %v1737_v20 = vld [vmem:[%s1997_s5 + $0x8] sm:$0xff] }
  0x7c   :  { %v43_v21 = vpop.permute.xlu0 %42  ;;  %v49_v25 = vpop.permute.xlu1 %48 }
  0x7d   :  { %vm63_vm3 = vcmp.eq.s32.totalorder %v43_v21, %v37_v17  ;;  %vm65_vm5 = vcmp.eq.s32.totalorder %v49_v25, %v37_v17 }
  0x7e   :  { %v1310_v22 = vsel %vm63_vm3, 1.0, %v1512_v19  ;;  %v1312_v26 = vsel %vm65_vm5, 1.0, %v1512_v19 }
  0x7f   :  { %1319 = vmatmul.msk.f32.gmra.mxu0 %vm93_vm1, %v1310_v22 }
  0x84   :  { %v58_v34 = vpop.permute.xlu0 %57  ;;  %v61_v36 = vpop.permute.xlu1 %60 }
  0x85   :  { %vm68_vm8 = vcmp.eq.s32.totalorder %v58_v34, %v37_v17  ;;  %vm69_vm9 = vcmp.eq.s32.totalorder %v61_v36, %v37_v17  ;;  %v1713_v17 = vld [vmem:[%s1997_s5 + $0x20] sm:$0xff] }
  0x86   :  { %v1315_v35 = vsel %vm68_vm8, 1.0, %v1512_v19  ;;  %v1316_v37 = vsel %vm69_vm9, 1.0, %v1512_v19  ;;  %910 = vmatpush.msrb.mxu1 %v1713_v17  ;;  %1168 = vmatpush.msrb.mxu0 %v1713_v17 }
  0x87   :  { %1320 = vmatmul.msk.f32.gmra.mxu0 %vm93_vm1, %v1311_v24 }
  0x88   :  { %911 = vmatpush.msrb.mxu1 %v1721_v18  ;;  %1169 = vmatpush.msrb.mxu0 %v1721_v18 }
  0x8f   :  { %1321 = vmatmul.msk.f32.gmra.mxu0 %vm93_vm1, %v1312_v26 }
  0x97   :  { %1322 = vmatmul.msk.f32.gmra.mxu0 %vm93_vm1, %v1313_v31 }
  0x9f   :  { %1323 = vmatmul.msk.f32.gmra.mxu0 %vm93_vm1, %v1314_v33 }
  0xa7   :  { %1324 = vmatmul.msk.f32.gmra.mxu0 %vm93_vm1, %v1315_v35 }
  0xaf   :  { %1325 = vmatmul.msk.f32.gmra.mxu0 %vm93_vm1, %v1316_v37 }
  0xf4   :  { %v139_v39 = vpop.f32.mrf.mxu0 }
  0xf5   :  { %1326 = vmatmul.msk.f32.vlgmr.msra.gmra.mxu1 %vm171_vm10, %v139_v39 }
  0xfc   :  { %v142_v40 = vpop.f32.mrf.mxu0 }
  0xfd   :  { %1327 = vmatmul.msk.f32.gmra.mxu1 %vm171_vm10, %v142_v40 }
 0x104   :  { %v145_v41 = vpop.f32.mrf.mxu0 }
 0x105   :  { %1328 = vmatmul.msk.f32.gmra.mxu1 %vm171_vm10, %v145_v41 }
 0x10c   :  { %v148_v42 = vpop.f32.mrf.mxu0 }
 0x10d   :  { %1329 = vmatmul.msk.f32.gmra.mxu1 %vm171_vm10, %v148_v42 }
 0x114   :  { %v151_v47 = vpop.f32.mrf.mxu0 }
 0x115   :  { %1330 = vmatmul.msk.f32.gmra.mxu1 %vm171_vm10, %v151_v47 }
 0x11c   :  { %v154_v48 = vpop.f32.mrf.mxu0 }
 0x11d   :  { %1331 = vmatmul.msk.f32.gmra.mxu1 %vm171_vm10, %v154_v48 }
 0x124   :  { %v157_v49 = vpop.f32.mrf.mxu0 }
 0x125   :  { %1332 = vmatmul.msk.f32.gmra.mxu1 %vm171_vm10, %v157_v49 }
 0x12c   :  { %v160_v50 = vpop.f32.mrf.mxu0 }
 0x12d   :  { %1333 = vmatmul.msk.f32.vlgmr.msra.gmra.mxu2 %vm171_vm10, %v160_v50 }
 0x12e   :  { %391 = vmatpush.msra.mxu2 %v1693_v14 }
 0x130   :  { %392 = vmatpush.msra.mxu2 %v1698_v15 }
 0x132   :  { %393 = vmatpush.msra.mxu2 %v1705_v16 }
 0x134   :  { %394 = vmatpush.msra.mxu2 %v1713_v17 }
 0x135   :  { %269 = vmatmul.f32.vlgmr.msrb.gmra.mxu2 %v1512_v19  ;;  %v1729_v19 = vld [vmem:[%s1997_s5 + $0x10] sm:$0xff] }
 0x136   :  { %395 = vmatpush.msra.mxu2 %v1721_v18  ;;  %912 = vmatpush.msrb.mxu1 %v1729_v19 }
 0x137   :  { %1170 = vmatpush.msrb.mxu0 %v1729_v19 }
 0x138   :  { %396 = vmatpush.msra.mxu2 %v1729_v19  ;;  %913 = vmatpush.msrb.mxu1 %v1737_v20 }
 0x139   :  { %1171 = vmatpush.msrb.mxu0 %v1737_v20 }
 0x13a   :  { %397 = vmatpush.msra.mxu2 %v1737_v20  ;;  %914 = vmatpush.msrb.mxu1 %v1750_v23 }
 0x13b   :  { %1172 = vmatpush.msrb.mxu0 %v1750_v23 }
 0x13c   :  { %398 = vmatpush.msra.mxu2 %v1750_v23  ;;  %1234 = vmatpush.msra.mxu1 %v1693_v14 }
 0x13e   :  { %586 = vmatpush.msrb.mxu2 %v1641_v43  ;;  %1235 = vmatpush.msra.mxu1 %v1698_v15 }
 0x140   :  { %587 = vmatpush.msrb.mxu2 %v1646_v44  ;;  %1236 = vmatpush.msra.mxu1 %v1705_v16 }
 0x142   :  { %588 = vmatpush.msrb.mxu2 %v1653_v45  ;;  %1237 = vmatpush.msra.mxu1 %v1713_v17 }
 0x144   :  { %589 = vmatpush.msrb.mxu2 %v1660_v46  ;;  %1238 = vmatpush.msra.mxu1 %v1721_v18 }
 0x146   :  { %1239 = vmatpush.msra.mxu1 %v1729_v19 }
 0x148   :  { %1240 = vmatpush.msra.mxu1 %v1737_v20 }
 0x14a   :  { %1241 = vmatpush.msra.mxu1 %v1750_v23 }
 0x172   :  { %v213_v54 = vpop.f32.mrf.mxu1 }
 0x173   :  { %v214_v55 = vadd.f32 %v1678_v51, %v213_v54 }
 0x17a   :  { %v216_v26 = vpop.f32.mrf.mxu1 }
 0x17b   :  { %v217_v28 = vadd.f32 %v1678_v51, %v216_v26 }
 0x1b0   :  { %v234_v52 = vpop.f32.mrf.mxu2 }
 0x1b1   :  { %v1681_v53 = vadd.f32 %v1678_v51, %v234_v52 }
 0x1b8   :  { %v270_v56 = vpop.f32.mrf.mxu2 }
 0x1b9   :  { %v273_v57 = vadd.f32 %v270_v56, %v214_v55 }
 0x1bb   :  { %1381 = vtanh.f32 %v273_v57  ;;  %v1334_v59 = vmul.f32 -1.442695, %v273_v57 }
 0x1bd   :  { %1383 = vpow2.f32 %v1334_v59 }
 0x1c1   :  { %v1382_v58 = vpop.eup %1381 }
 0x1c2   :  { %296 = vrot.lane.b32.xlu2 %v1382_v58, %s1513_s27 }
 0x1c3   :  { %v1384_v60 = vpop.eup %1383 }
 0x1c4   :  { %v277_v61 = vadd.f32 1.0, %v1384_v60 }
 0x1c6   :  { %1385 = vrcp.f32 %v277_v61  ;;  %v289_v3 = vand.u32 2147483648, %v277_v61  ;;  %vm283_vm12 = vweird.f32 %v277_v61  ;;  %v287_v4 = vand.u32 2147483647, %v277_v61 }
 0x1c8   :  { %v290_v6 = vor.u32 1.1754944e-38, %v289_v3  ;;  %vm288_vm14 = vcmp.eq.f32.partialorder %v287_v4, 8.507059e+37 }
 0x1cc   :  { %v1386_v62 = vpop.eup %1385 }
 0x1cd   :  { %v279_v63 = vmul.f32 %v1386_v62, %v277_v61  ;;  %vm284_vm11 = vweird.f32 %v1386_v62 }
 0x1ce   :  { %vm285_vm13 = vmor %vm283_vm12, %vm284_vm11 }
 0x1cf   :  { %v280_v0 = vsub.f32 1.0, %v279_v63 }
 0x1d1   :  { %v281_v1 = vmul.f32 %v1386_v62, %v280_v0 }
 0x1d3   :  { %v282_v2 = vadd.f32 %v1386_v62, %v281_v1 }
 0x1d5   :  { %v286_v5 = vsel %vm285_vm13, %v1386_v62, %v282_v2 }
 0x1d6   :  { %v291_v8 = vsel %vm288_vm14, %v290_v6, %v286_v5 }
 0x1d7   :  { %v294_v10 = vmul.f32 0.0, %v291_v8 }
 0x21c   :  { %v297_v7 = vpop.permute.xlu2 %296 }
 0x21d   :  { %v299_v9 = vmul.f32 %v297_v7, %v291_v8 }
 0x21f   :  { %301 = vrot.lane.b32.xlu0 %v299_v9, %s1514_s28 }
 0x291   :  { %v302_v11 = vpop.permute.xlu0 %301 }
 0x292   :  { %v1686_v12 = vadd.f32 %v302_v11, %v294_v10 }
 0x294   :  { %1387 = vtanh.f32 %v1686_v12 }
 0x29a   :  { %v1388_v13 = vpop.eup %1387 }
 0x29b   :  { %307 = vrot.lane.b32.xlu1 %v1388_v13, %s1513_s27 }
 0x30d   :  { %v308_v21 = vpop.permute.xlu1 %307 }
 0x30e   :  { %v310_v22 = vmul.f32 %v308_v21, %v291_v8 }
 0x310   :  { %312 = vrot.lane.b32.xlu2 %v310_v22, %s1514_s28 }
 0x36a   :  { %v313_v24 = vpop.permute.xlu2 %312 }
 0x36b   :  { %v375_v25 = vsel %vm171_vm10, %v313_v24, 0.0  ;;  %1335 = vmatmul.msk.f32.vlgmr.msra.gmra.mxu3 %vm171_vm10, %v313_v24 }
 0x36c   :  { %1337 = vmatmul.msk.f32.vlgmr.msra.gmra.mxu2 %vm379_vm15, %v375_v25  ;;  %520 = vmatpush.msra.mxu3 %v1693_v14 }
 0x36d   :  { %649 = vmatpush.msra.mxu2 %v1693_v14 }
 0x36e   :  { %521 = vmatpush.msra.mxu3 %v1698_v15 }
 0x36f   :  { %650 = vmatpush.msra.mxu2 %v1698_v15 }
 0x370   :  { %522 = vmatpush.msra.mxu3 %v1705_v16 }
 0x371   :  { %651 = vmatpush.msra.mxu2 %v1705_v16 }
 0x372   :  { %523 = vmatpush.msra.mxu3 %v1713_v17 }
 0x373   :  { %652 = vmatpush.msra.mxu2 %v1713_v17 }
 0x374   :  { %524 = vmatpush.msra.mxu3 %v1721_v18 }
 0x375   :  { %653 = vmatpush.msra.mxu2 %v1721_v18 }
 0x376   :  { %525 = vmatpush.msra.mxu3 %v1729_v19 }
 0x377   :  { %654 = vmatpush.msra.mxu2 %v1729_v19 }
 0x378   :  { %526 = vmatpush.msra.mxu3 %v1737_v20 }
 0x379   :  { %655 = vmatpush.msra.mxu2 %v1737_v20 }
 0x37a   :  { %527 = vmatpush.msra.mxu3 %v1750_v23 }
 0x37b   :  { %656 = vmatpush.msra.mxu2 %v1750_v23 }
 0x3ee   :  { %v333_v29 = vpop.f32.mrf.mxu3 }
 0x3ef   :  { %v336_v30 = vadd.f32 %v333_v29, %v217_v28  ;;  %v400_v31 = vpop.f32.mrf.mxu2 }
 0x3f0   :  { %v401_v32 = vadd.f32 %v1789_v27, %v400_v31  ;;  %v219_v31 = vpop.f32.mrf.mxu1 }
 0x3f1   :  { %1389 = vtanh.f32 %v336_v30  ;;  %v1336_v35 = vmul.f32 -1.442695, %v336_v30 }
 0x3f2   :  { %1391 = vtanh.f32 %v401_v32  ;;  %v1338_v36 = vmul.f32 -1.442695, %v401_v32  ;;  %v220_v32 = vadd.f32 %v1678_v51, %v219_v31 }
 0x3f3   :  { %1393 = vpow2.f32 %v1336_v35 }
 0x3f4   :  { %1395 = vpow2.f32 %v1338_v36 }
 0x3f7   :  { %v1390_v33 = vpop.eup %1389 }
 0x3f8   :  { %v1392_v34 = vpop.eup %1391  ;;  %359 = vrot.lane.b32.xlu0 %v1390_v33, %s1513_s27 }
 0x3f9   :  { %425 = vrot.lane.b32.xlu1 %v1392_v34, %s1513_s27  ;;  %v1394_v37 = vpop.eup %1393 }
 0x3fa   :  { %v1396_v38 = vpop.eup %1395  ;;  %v340_v39 = vadd.f32 1.0, %v1394_v37 }
 0x3fb   :  { %v406_v40 = vadd.f32 1.0, %v1396_v38 }
 0x3fc   :  { %1397 = vrcp.f32 %v340_v39  ;;  %v352_v56 = vand.u32 2147483648, %v340_v39  ;;  %vm346_vm2 = vweird.f32 %v340_v39  ;;  %v350_v58 = vand.u32 2147483647, %v340_v39 }
 0x3fd   :  { %1399 = vrcp.f32 %v406_v40  ;;  %v418_v59 = vand.u32 2147483648, %v406_v40  ;;  %vm412_vm4 = vweird.f32 %v406_v40  ;;  %v416_v60 = vand.u32 2147483647, %v406_v40 }
 0x3fe   :  { %v353_v62 = vor.u32 1.1754944e-38, %v352_v56  ;;  %vm351_vm6 = vcmp.eq.f32.partialorder %v350_v58, 8.507059e+37 }
 0x3ff   :  { %v419_v0 = vor.u32 1.1754944e-38, %v418_v59  ;;  %vm417_vm7 = vcmp.eq.f32.partialorder %v416_v60, 8.507059e+37 }
 0x402   :  { %v1398_v41 = vpop.eup %1397 }
 0x403   :  { %v1400_v42 = vpop.eup %1399  ;;  %v342_v47 = vmul.f32 %v1398_v41, %v340_v39  ;;  %vm347_vm0 = vweird.f32 %v1398_v41 }
 0x404   :  { %v408_v48 = vmul.f32 %v1400_v42, %v406_v40  ;;  %vm413_vm1 = vweird.f32 %v1400_v42  ;;  %vm348_vm3 = vmor %vm346_vm2, %vm347_vm0 }
 0x405   :  { %v343_v49 = vsub.f32 1.0, %v342_v47  ;;  %vm414_vm5 = vmor %vm412_vm4, %vm413_vm1 }
 0x406   :  { %v409_v50 = vsub.f32 1.0, %v408_v48 }
 0x407   :  { %v344_v52 = vmul.f32 %v1398_v41, %v343_v49 }
 0x408   :  { %v410_v54 = vmul.f32 %v1400_v42, %v409_v50 }
 0x409   :  { %v345_v55 = vadd.f32 %v1398_v41, %v344_v52 }
 0x40a   :  { %v411_v57 = vadd.f32 %v1400_v42, %v410_v54 }
 0x40b   :  { %v349_v61 = vsel %vm348_vm3, %v1398_v41, %v345_v55 }
 0x40c   :  { %v415_v63 = vsel %vm414_vm5, %v1400_v42, %v411_v57  ;;  %v354_v2 = vsel %vm351_vm6, %v353_v62, %v349_v61 }
 0x40d   :  { %v420_v5 = vsel %vm417_vm7, %v419_v0, %v415_v63  ;;  %v357_v7 = vmul.f32 %v354_v2, %v1686_v12 }
 0x40e   :  { %v423_v11 = vmul.f32 0.0, %v420_v5 }
 0x46a   :  { %v360_v1 = vpop.permute.xlu0 %359 }
 0x46b   :  { %v362_v3 = vmul.f32 %v360_v1, %v354_v2  ;;  %v426_v4 = vpop.permute.xlu1 %425 }
 0x46c   :  { %v428_v6 = vmul.f32 %v426_v4, %v420_v5 }
 0x46d   :  { %364 = vrot.lane.b32.xlu2 %v362_v3, %s1514_s28 }
 0x46e   :  { %430 = vrot.lane.b32.xlu0 %v428_v6, %s1514_s28 }
 0x4c7   :  { %v365_v8 = vpop.permute.xlu2 %364 }
 0x4c8   :  { %v1798_v9 = vadd.f32 %v365_v8, %v357_v7 }
 0x4ca   :  { %1401 = vtanh.f32 %v1798_v9 }
 0x4d0   :  { %v1402_v10 = vpop.eup %1401 }
 0x4d1   :  { %370 = vrot.lane.b32.xlu1 %v1402_v10, %s1513_s27 }
 0x4e0   :  { %v431_v13 = vpop.permute.xlu0 %430 }
 0x4e1   :  { %v1802_v21 = vadd.f32 %v431_v13, %v423_v11 }
 0x4e3   :  { %1403 = vtanh.f32 %v1802_v21 }
 0x4e9   :  { %v1404_v22 = vpop.eup %1403 }
 0x4ea   :  { %436 = vrot.lane.b32.xlu2 %v1404_v22, %s1513_s27 }
 0x543   :  { %v371_v24 = vpop.permute.xlu1 %370 }
 0x544   :  { %v373_v25 = vmul.f32 %v371_v24, %v354_v2  ;;  %v437_v12 = vpop.permute.xlu2 %436 }
 0x545   :  { %v439_v26 = vmul.f32 %v437_v12, %v420_v5 }
 0x546   :  { %441 = vrot.lane.b32.xlu0 %v373_v25, %s1514_s28 }
 0x547   :  { %505 = vrot.lane.b32.xlu1 %v439_v26, %s1513_s27 }
 0x5b8   :  { %v442_v28 = vpop.permute.xlu0 %441 }
 0x5b9   :  { %1339 = vmatmul.msk.f32.vlgmr.msrb.gmra.mxu3 %vm171_vm10, %v442_v28  ;;  %v506_v29 = vpop.permute.xlu1 %505 }
 0x5ba   :  { %715 = vmatpush.msrb.mxu3 %v1641_v43  ;;  %v508_v30 = vsel %vm171_vm10, %v442_v28, %v506_v29 }
 0x5bc   :  { %716 = vmatpush.msrb.mxu3 %v1646_v44 }
 0x5be   :  { %717 = vmatpush.msrb.mxu3 %v1653_v45 }
 0x5c0   :  { %718 = vmatpush.msrb.mxu3 %v1660_v46 }
 0x5c1   :  { %1341 = vmatmul.msk.f32.vlgmr.msra.gmra.mxu3 %vm379_vm15, %v508_v30 }
 0x5c2   :  { %778 = vmatpush.msra.mxu3 %v1693_v14 }
 0x5c4   :  { %779 = vmatpush.msra.mxu3 %v1698_v15 }
 0x5c6   :  { %780 = vmatpush.msra.mxu3 %v1705_v16 }
 0x5c8   :  { %781 = vmatpush.msra.mxu3 %v1713_v17 }
 0x5ca   :  { %782 = vmatpush.msra.mxu3 %v1721_v18 }
 0x5cc   :  { %783 = vmatpush.msra.mxu3 %v1729_v19 }
 0x5ce   :  { %784 = vmatpush.msra.mxu3 %v1737_v20 }
 0x5d0   :  { %785 = vmatpush.msra.mxu3 %v1750_v23 }
 0x63c   :  { %v462_v33 = vpop.f32.mrf.mxu3 }
 0x63d   :  { %v465_v34 = vadd.f32 %v462_v33, %v220_v32 }
 0x63f   :  { %1405 = vtanh.f32 %v465_v34  ;;  %v1340_v39 = vmul.f32 -1.442695, %v465_v34 }
 0x644   :  { %v529_v35 = vpop.f32.mrf.mxu3 }
 0x645   :  { %v1406_v36 = vpop.eup %1405  ;;  %v530_v37 = vadd.f32 %v1789_v27, %v529_v35  ;;  %v222_v35 = vpop.f32.mrf.mxu1 }
 0x646   :  { %488 = vrot.lane.b32.xlu2 %v1406_v36, %s1513_s27  ;;  %v223_v36 = vadd.f32 %v1678_v51, %v222_v35 }
 0x647   :  { %1407 = vtanh.f32 %v530_v37  ;;  %v1342_v49 = vmul.f32 -1.442695, %v530_v37 }
 0x648   :  { %1409 = vpow2.f32 %v1340_v39 }
 0x64d   :  { %v1408_v38 = vpop.eup %1407 }
 0x64e   :  { %554 = vrot.lane.b32.xlu0 %v1408_v38, %s1513_s27  ;;  %v1410_v40 = vpop.eup %1409 }
 0x64f   :  { %v469_v41 = vadd.f32 1.0, %v1410_v40 }
 0x651   :  { %1411 = vrcp.f32 %v469_v41  ;;  %v481_v54 = vand.u32 2147483648, %v469_v41  ;;  %vm475_vm9 = vweird.f32 %v469_v41  ;;  %v479_v55 = vand.u32 2147483647, %v469_v41 }
 0x652   :  { %1413 = vpow2.f32 %v1342_v49 }
 0x653   :  { %v482_v58 = vor.u32 1.1754944e-38, %v481_v54  ;;  %vm480_vm12 = vcmp.eq.f32.partialorder %v479_v55, 8.507059e+37 }
 0x657   :  { %v1412_v42 = vpop.eup %1411 }
 0x658   :  { %v471_v47 = vmul.f32 %v1412_v42, %v469_v41  ;;  %vm476_vm8 = vweird.f32 %v1412_v42  ;;  %v1414_v56 = vpop.eup %1413 }
 0x659   :  { %vm477_vm11 = vmor %vm475_vm9, %vm476_vm8  ;;  %v535_v59 = vadd.f32 1.0, %v1414_v56 }
 0x65a   :  { %v472_v48 = vsub.f32 1.0, %v471_v47 }
 0x65b   :  { %1415 = vrcp.f32 %v535_v59  ;;  %v547_v4 = vand.u32 2147483648, %v535_v59  ;;  %vm541_vm14 = vweird.f32 %v535_v59  ;;  %v545_v5 = vand.u32 2147483647, %v535_v59 }
 0x65c   :  { %v473_v50 = vmul.f32 %v1412_v42, %v472_v48 }
 0x65d   :  { %v548_v7 = vor.u32 1.1754944e-38, %v547_v4  ;;  %vm546_vm1 = vcmp.eq.f32.partialorder %v545_v5, 8.507059e+37 }
 0x65e   :  { %v474_v52 = vadd.f32 %v1412_v42, %v473_v50 }
 0x660   :  { %v478_v57 = vsel %vm477_vm11, %v1412_v42, %v474_v52 }
 0x661   :  { %v483_v60 = vsel %vm480_vm12, %v482_v58, %v478_v57  ;;  %v1416_v63 = vpop.eup %1415 }
 0x662   :  { %v537_v0 = vmul.f32 %v1416_v63, %v535_v59  ;;  %vm542_vm13 = vweird.f32 %v1416_v63  ;;  %v486_v13 = vmul.f32 %v483_v60, %v1798_v9 }
 0x663   :  { %vm543_vm0 = vmor %vm541_vm14, %vm542_vm13 }
 0x664   :  { %v538_v1 = vsub.f32 1.0, %v537_v0 }
 0x666   :  { %v539_v2 = vmul.f32 %v1416_v63, %v538_v1 }
 0x668   :  { %v540_v3 = vadd.f32 %v1416_v63, %v539_v2 }
 0x66a   :  { %v544_v6 = vsel %vm543_vm0, %v1416_v63, %v540_v3 }
 0x66b   :  { %v549_v10 = vsel %vm546_vm1, %v548_v7, %v544_v6 }
 0x66c   :  { %v552_v25 = vmul.f32 %v549_v10, %v1802_v21 }
 0x6a0   :  { %v489_v61 = vpop.permute.xlu2 %488 }
 0x6a1   :  { %v491_v62 = vmul.f32 %v489_v61, %v483_v60 }
 0x6a3   :  { %493 = vrot.lane.b32.xlu1 %v491_v62, %s1514_s28 }
 0x6c0   :  { %v555_v8 = vpop.permute.xlu0 %554 }
 0x6c1   :  { %v557_v11 = vmul.f32 %v555_v8, %v549_v10 }
 0x6c3   :  { %559 = vrot.lane.b32.xlu2 %v557_v11, %s1514_s28 }
 0x715   :  { %v494_v22 = vpop.permute.xlu1 %493 }
 0x716   :  { %v1830_v24 = vadd.f32 %v494_v22, %v486_v13 }
 0x718   :  { %1417 = vtanh.f32 %v1830_v24 }
 0x71d   :  { %v560_v12 = vpop.permute.xlu2 %559 }
 0x71e   :  { %v1418_v26 = vpop.eup %1417  ;;  %v1834_v28 = vadd.f32 %v560_v12, %v552_v25 }
 0x71f   :  { %499 = vrot.lane.b32.xlu0 %v1418_v26, %s1513_s27 }
 0x720   :  { %1419 = vtanh.f32 %v1834_v28 }
 0x726   :  { %v1420_v29 = vpop.eup %1419 }
 0x727   :  { %565 = vrot.lane.b32.xlu1 %v1420_v29, %s1513_s27 }
 0x791   :  { %v500_v30 = vpop.permute.xlu0 %499 }
 0x792   :  { %v502_v9 = vmul.f32 %v500_v30, %v483_v60 }
 0x794   :  { %570 = vrot.lane.b32.xlu2 %v502_v9, %s1514_s28 }
 0x799   :  { %v566_v31 = vpop.permute.xlu1 %565 }
 0x79a   :  { %v568_v32 = vmul.f32 %v566_v31, %v549_v10 }
 0x79c   :  { %634 = vrot.lane.b32.xlu0 %v568_v32, %s1513_s27 }
 0x7ee   :  { %v571_v21 = vpop.permute.xlu2 %570 }
 0x7ef   :  { %1343 = vmatmul.msk.f32.vlgmr.msrb.gmra.mxu2 %vm171_vm10, %v571_v21 }
 0x7f0   :  { %844 = vmatpush.msrb.mxu2 %v1641_v43 }
 0x7f2   :  { %845 = vmatpush.msrb.mxu2 %v1646_v44 }
 0x7f4   :  { %846 = vmatpush.msrb.mxu2 %v1653_v45 }
 0x7f6   :  { %847 = vmatpush.msrb.mxu2 %v1660_v46 }
 0x80e   :  { %v635_v33 = vpop.permute.xlu0 %634 }
 0x80f   :  { %v637_v34 = vsel %vm171_vm10, %v571_v21, %v635_v33 }
 0x810   :  { %1345 = vmatmul.msk.f32.vlgmr.msra.gmra.mxu2 %vm379_vm15, %v637_v34 }
 0x811   :  { %973 = vmatpush.msra.mxu2 %v1641_v43 }
 0x813   :  { %974 = vmatpush.msra.mxu2 %v1646_v44 }
 0x815   :  { %975 = vmatpush.msra.mxu2 %v1653_v45 }
 0x817   :  { %976 = vmatpush.msra.mxu2 %v1660_v46 }
 0x872   :  { %v591_v37 = vpop.f32.mrf.mxu2 }
 0x873   :  { %v594_v38 = vadd.f32 %v591_v37, %v223_v36 }
 0x875   :  { %1421 = vtanh.f32 %v594_v38  ;;  %v1344_v47 = vmul.f32 -1.442695, %v594_v38 }
 0x87b   :  { %v1422_v39 = vpop.eup %1421 }
 0x87c   :  { %617 = vrot.lane.b32.xlu1 %v1422_v39, %s1513_s27 }
 0x893   :  { %v658_v40 = vpop.f32.mrf.mxu2 }
 0x894   :  { %v659_v41 = vadd.f32 %v1789_v27, %v658_v40 }
 0x896   :  { %1423 = vtanh.f32 %v659_v41  ;;  %v1346_v48 = vmul.f32 -1.442695, %v659_v41 }
 0x897   :  { %1425 = vpow2.f32 %v1344_v47 }
 0x898   :  { %1427 = vpow2.f32 %v1346_v48 }
 0x89c   :  { %v1424_v42 = vpop.eup %1423 }
 0x89d   :  { %683 = vrot.lane.b32.xlu2 %v1424_v42, %s1513_s27  ;;  %v1426_v49 = vpop.eup %1425 }
 0x89e   :  { %v598_v50 = vadd.f32 1.0, %v1426_v49  ;;  %v1428_v52 = vpop.eup %1427 }
 0x89f   :  { %v664_v54 = vadd.f32 1.0, %v1428_v52 }
 0x8a0   :  { %1429 = vrcp.f32 %v598_v50  ;;  %v610_v62 = vand.u32 2147483648, %v598_v50  ;;  %vm604_vm3 = vweird.f32 %v598_v50  ;;  %v608_v0 = vand.u32 2147483647, %v598_v50 }
 0x8a1   :  { %1431 = vrcp.f32 %v664_v54  ;;  %v676_v8 = vand.u32 2147483648, %v664_v54  ;;  %vm670_vm7 = vweird.f32 %v664_v54  ;;  %v674_v10 = vand.u32 2147483647, %v664_v54 }
 0x8a2   :  { %v611_v2 = vor.u32 1.1754944e-38, %v610_v62  ;;  %vm609_vm5 = vcmp.eq.f32.partialorder %v608_v0, 8.507059e+37 }
 0x8a3   :  { %v677_v13 = vor.u32 1.1754944e-38, %v676_v8  ;;  %vm675_vm9 = vcmp.eq.f32.partialorder %v674_v10, 8.507059e+37 }
 0x8a6   :  { %v1430_v55 = vpop.eup %1429 }
 0x8a7   :  { %v600_v56 = vmul.f32 %v1430_v55, %v598_v50  ;;  %v1432_v58 = vpop.eup %1431  ;;  %vm605_vm2 = vweird.f32 %v1430_v55 }
 0x8a8   :  { %v666_v60 = vmul.f32 %v1432_v58, %v664_v54  ;;  %vm606_vm4 = vmor %vm604_vm3, %vm605_vm2  ;;  %vm671_vm6 = vweird.f32 %v1432_v58 }
 0x8a9   :  { %v601_v57 = vsub.f32 1.0, %v600_v56  ;;  %vm672_vm8 = vmor %vm670_vm7, %vm671_vm6 }
 0x8aa   :  { %v667_v63 = vsub.f32 1.0, %v666_v60 }
 0x8ab   :  { %v602_v59 = vmul.f32 %v1430_v55, %v601_v57 }
 0x8ac   :  { %v668_v3 = vmul.f32 %v1432_v58, %v667_v63 }
 0x8ad   :  { %v603_v61 = vadd.f32 %v1430_v55, %v602_v59 }
 0x8ae   :  { %v669_v7 = vadd.f32 %v1432_v58, %v668_v3 }
 0x8af   :  { %v607_v1 = vsel %vm606_vm4, %v1430_v55, %v603_v61 }
 0x8b0   :  { %v612_v5 = vsel %vm609_vm5, %v611_v2, %v607_v1  ;;  %v673_v11 = vsel %vm672_vm8, %v1432_v58, %v669_v7 }
 0x8b1   :  { %v678_v25 = vsel %vm675_vm9, %v677_v13, %v673_v11  ;;  %v615_v26 = vmul.f32 %v612_v5, %v1830_v24 }
 0x8b2   :  { %v681_v9 = vmul.f32 %v678_v25, %v1834_v28 }
 0x8ee   :  { %v618_v4 = vpop.permute.xlu1 %617 }
 0x8ef   :  { %v620_v6 = vmul.f32 %v618_v4, %v612_v5 }
 0x8f1   :  { %622 = vrot.lane.b32.xlu0 %v620_v6, %s1514_s28 }
 0x8f7   :  { %v684_v22 = vpop.permute.xlu2 %683 }
 0x8f8   :  { %v686_v12 = vmul.f32 %v684_v22, %v678_v25 }
 0x8fa   :  { %688 = vrot.lane.b32.xlu1 %v686_v12, %s1514_s28 }
 0x963   :  { %v623_v29 = vpop.permute.xlu0 %622 }
 0x964   :  { %v1859_v30 = vadd.f32 %v623_v29, %v615_v26 }
 0x966   :  { %1433 = vtanh.f32 %v1859_v30 }
 0x96c   :  { %v1434_v31 = vpop.eup %1433  ;;  %v689_v32 = vpop.permute.xlu1 %688 }
 0x96d   :  { %v1863_v21 = vadd.f32 %v689_v32, %v681_v9  ;;  %628 = vrot.lane.b32.xlu2 %v1434_v31, %s1513_s27 }
 0x96f   :  { %1435 = vtanh.f32 %v1863_v21 }
 0x975   :  { %v1436_v33 = vpop.eup %1435 }
 0x976   :  { %694 = vrot.lane.b32.xlu0 %v1436_v33, %s1513_s27 }
 0x9c7   :  { %v629_v34 = vpop.permute.xlu2 %628 }
 0x9c8   :  { %v631_v24 = vmul.f32 %v629_v34, %v612_v5 }
 0x9ca   :  { %699 = vrot.lane.b32.xlu1 %v631_v24, %s1514_s28 }
 0x9e8   :  { %v695_v35 = vpop.permute.xlu0 %694 }
 0x9e9   :  { %v697_v36 = vmul.f32 %v695_v35, %v678_v25 }
 0x9eb   :  { %763 = vrot.lane.b32.xlu2 %v697_v36, %s1513_s27 }
 0xa3c   :  { %v700_v28 = vpop.permute.xlu1 %699 }
 0xa3d   :  { %1347 = vmatmul.msk.f32.vlgmr.msrb.gmra.mxu3 %vm171_vm10, %v700_v28 }
 0xa3e   :  { %1036 = vmatpush.msrb.mxu3 %v1693_v14  ;;  %v225_v14 = vpop.f32.mrf.mxu1 }
 0xa40   :  { %1037 = vmatpush.msrb.mxu3 %v1698_v15  ;;  %v226_v15 = vadd.f32 %v1678_v51, %v225_v14 }
 0xa42   :  { %1038 = vmatpush.msrb.mxu3 %v1705_v16 }
 0xa44   :  { %1039 = vmatpush.msrb.mxu3 %v1713_v17 }
 0xa45   :  { %v764_v37 = vpop.permute.xlu2 %763 }
 0xa46   :  { %v766_v38 = vsel %vm171_vm10, %v700_v28, %v764_v37  ;;  %1040 = vmatpush.msrb.mxu3 %v1721_v18  ;;  %v228_v36 = vpop.f32.mrf.mxu1 }
 0xa47   :  { %1349 = vmatmul.msk.f32.vlgmr.msra.gmra.mxu3 %vm379_vm15, %v766_v38  ;;  %v229_v37 = vadd.f32 %v1678_v51, %v228_v36 }
 0xa48   :  { %1041 = vmatpush.msrb.mxu3 %v1729_v19 }
 0xa4a   :  { %1042 = vmatpush.msrb.mxu3 %v1737_v20 }
 0xa4c   :  { %1043 = vmatpush.msrb.mxu3 %v1750_v23 }
 0xa4e   :  { %v1906_v28 = vpop.f32.mrf.mxu1 }
 0xac0   :  { %v720_v39 = vpop.f32.mrf.mxu3 }
 0xac1   :  { %v723_v16 = vadd.f32 %v720_v39, %v226_v15 }
 0xac3   :  { %1437 = vtanh.f32 %v723_v16  ;;  %v1348_v19 = vmul.f32 -1.442695, %v723_v16 }
 0xac9   :  { %v1438_v17 = vpop.eup %1437 }
 0xaca   :  { %746 = vrot.lane.b32.xlu0 %v1438_v17, %s1513_s27  ;;  %v787_v40 = vpop.f32.mrf.mxu3 }
 0xacb   :  { %v788_v18 = vadd.f32 %v1789_v27, %v787_v40 }
 0xacd   :  { %1439 = vtanh.f32 %v788_v18  ;;  %v1350_v23 = vmul.f32 -1.442695, %v788_v18 }
 0xace   :  { %1441 = vpow2.f32 %v1348_v19 }
 0xacf   :  { %1443 = vpow2.f32 %v1350_v23 }
 0xad3   :  { %v1440_v41 = vpop.eup %1439 }
 0xad4   :  { %812 = vrot.lane.b32.xlu1 %v1440_v41, %s1513_s27  ;;  %v1442_v20 = vpop.eup %1441 }
 0xad5   :  { %v727_v42 = vadd.f32 1.0, %v1442_v20  ;;  %v1444_v47 = vpop.eup %1443 }
 0xad6   :  { %v793_v49 = vadd.f32 1.0, %v1444_v47 }
 0xad7   :  { %1445 = vrcp.f32 %v727_v42  ;;  %v739_v58 = vand.u32 2147483648, %v727_v42  ;;  %vm733_vm12 = vweird.f32 %v727_v42  ;;  %v737_v59 = vand.u32 2147483647, %v727_v42 }
 0xad8   :  { %1447 = vrcp.f32 %v793_v49  ;;  %v805_v4 = vand.u32 2147483648, %v793_v49  ;;  %vm799_vm1 = vweird.f32 %v793_v49  ;;  %v803_v5 = vand.u32 2147483647, %v793_v49 }
 0xad9   :  { %v740_v62 = vor.u32 1.1754944e-38, %v739_v58  ;;  %vm738_vm14 = vcmp.eq.f32.partialorder %v737_v59, 8.507059e+37 }
 0xada   :  { %v806_v7 = vor.u32 1.1754944e-38, %v805_v4  ;;  %vm804_vm3 = vcmp.eq.f32.partialorder %v803_v5, 8.507059e+37 }
 0xadd   :  { %v1446_v48 = vpop.eup %1445 }
 0xade   :  { %v729_v50 = vmul.f32 %v1446_v48, %v727_v42  ;;  %v1448_v54 = vpop.eup %1447  ;;  %vm734_vm11 = vweird.f32 %v1446_v48 }
 0xadf   :  { %v795_v56 = vmul.f32 %v1448_v54, %v793_v49  ;;  %vm735_vm13 = vmor %vm733_vm12, %vm734_vm11  ;;  %vm800_vm0 = vweird.f32 %v1448_v54 }
 0xae0   :  { %v730_v52 = vsub.f32 1.0, %v729_v50  ;;  %vm801_vm2 = vmor %vm799_vm1, %vm800_vm0 }
 0xae1   :  { %v796_v60 = vsub.f32 1.0, %v795_v56 }
 0xae2   :  { %v731_v55 = vmul.f32 %v1446_v48, %v730_v52 }
 0xae3   :  { %v797_v63 = vmul.f32 %v1448_v54, %v796_v60 }
 0xae4   :  { %v732_v57 = vadd.f32 %v1446_v48, %v731_v55 }
 0xae5   :  { %v798_v3 = vadd.f32 %v1448_v54, %v797_v63 }
 0xae6   :  { %v736_v61 = vsel %vm735_vm13, %v1446_v48, %v732_v57 }
 0xae7   :  { %v741_v0 = vsel %vm738_vm14, %v740_v62, %v736_v61  ;;  %v802_v6 = vsel %vm801_vm2, %v1448_v54, %v798_v3 }
 0xae8   :  { %v807_v10 = vsel %vm804_vm3, %v806_v7, %v802_v6  ;;  %v744_v13 = vmul.f32 %v741_v0, %v1859_v30 }
 0xae9   :  { %v810_v26 = vmul.f32 %v807_v10, %v1863_v21 }
 0xb3c   :  { %v747_v1 = vpop.permute.xlu0 %746 }
 0xb3d   :  { %v749_v2 = vmul.f32 %v747_v1, %v741_v0 }
 0xb3f   :  { %751 = vrot.lane.b32.xlu2 %v749_v2, %s1514_s28 }
 0xb46   :  { %v813_v8 = vpop.permute.xlu1 %812 }
 0xb47   :  { %v815_v11 = vmul.f32 %v813_v8, %v807_v10 }
 0xb49   :  { %817 = vrot.lane.b32.xlu0 %v815_v11, %s1514_s28 }
 0xb99   :  { %v752_v22 = vpop.permute.xlu2 %751 }
 0xb9a   :  { %v1888_v25 = vadd.f32 %v752_v22, %v744_v13 }
 0xb9c   :  { %1449 = vtanh.f32 %v1888_v25 }
 0xba2   :  { %v1450_v12 = vpop.eup %1449 }
 0xba3   :  { %757 = vrot.lane.b32.xlu1 %v1450_v12, %s1513_s27 }
 0xbbb   :  { %v818_v29 = vpop.permute.xlu0 %817 }
 0xbbc   :  { %v1893_v9 = vadd.f32 %v818_v29, %v810_v26 }
 0xbbe   :  { %1451 = vtanh.f32 %v1893_v9 }
 0xbc4   :  { %v1452_v31 = vpop.eup %1451 }
 0xbc5   :  { %823 = vrot.lane.b32.xlu2 %v1452_v31, %s1513_s27  ;;  %v1509_v31 = vld [vmem:[%s1995_s4] ss:$0 sm:$0xff] }
 0xc15   :  { %v758_v32 = vpop.permute.xlu1 %757 }
 0xc16   :  { %v760_v30 = vmul.f32 %v758_v32, %v741_v0  ;;  %v232_v32 = vadd.f32 %v1509_v31, %v1906_v28 }
 0xc18   :  { %828 = vrot.lane.b32.xlu0 %v760_v30, %s1514_s28 }
 0xc1f   :  { %v824_v33 = vpop.permute.xlu2 %823 }
 0xc20   :  { %v826_v34 = vmul.f32 %v824_v33, %v807_v10 }
 0xc22   :  { %892 = vrot.lane.b32.xlu1 %v826_v34, %s1513_s27 }
 0xc8a   :  { %v829_v24 = vpop.permute.xlu0 %828 }
 0xc8b   :  { %1351 = vmatmul.msk.f32.vlgmr.msrb.gmra.mxu2 %vm171_vm10, %v829_v24 }
 0xc8c   :  { %1102 = vmatpush.msrb.mxu2 %v1641_v43 }
 0xc8e   :  { %1103 = vmatpush.msrb.mxu2 %v1646_v44 }
 0xc90   :  { %1104 = vmatpush.msrb.mxu2 %v1653_v45 }
 0xc92   :  { %1105 = vmatpush.msrb.mxu2 %v1660_v46 }
 0xc94   :  { %v893_v21 = vpop.permute.xlu1 %892 }
 0xc95   :  { %v895_v35 = vsel %vm171_vm10, %v829_v24, %v893_v21 }
 0xc96   :  { %1353 = vmatmul.msk.f32.vlgmr.msrb.gmra.mxu1 %vm379_vm15, %v895_v35 }
 0xd0e   :  { %v849_v38 = vpop.f32.mrf.mxu2 }
 0xd0f   :  { %v852_v14 = vadd.f32 %v849_v38, %v229_v37 }
 0xd11   :  { %1453 = vtanh.f32 %v852_v14  ;;  %v1352_v15 = vmul.f32 -1.442695, %v852_v14 }
 0xd13   :  { %v916_v43 = vpop.f32.mrf.mxu1 }
 0xd14   :  { %v917_v44 = vadd.f32 %v1789_v27, %v916_v43 }
 0xd16   :  { %1455 = vtanh.f32 %v917_v44  ;;  %v1354_v40 = vmul.f32 -1.442695, %v917_v44 }
 0xd17   :  { %v1454_v45 = vpop.eup %1453  ;;  %1457 = vpow2.f32 %v1352_v15 }
 0xd18   :  { %875 = vrot.lane.b32.xlu2 %v1454_v45, %s1513_s27 }
 0xd1c   :  { %v1456_v46 = vpop.eup %1455 }
 0xd1d   :  { %941 = vrot.lane.b32.xlu0 %v1456_v46, %s1513_s27  ;;  %v1458_v39 = vpop.eup %1457 }
 0xd1e   :  { %v856_v16 = vadd.f32 1.0, %v1458_v39 }
 0xd20   :  { %1459 = vrcp.f32 %v856_v16  ;;  %v868_v23 = vand.u32 2147483648, %v856_v16  ;;  %vm862_vm5 = vweird.f32 %v856_v16  ;;  %v866_v42 = vand.u32 2147483647, %v856_v16 }
 0xd21   :  { %1461 = vpow2.f32 %v1354_v40 }
 0xd22   :  { %v869_v49 = vor.u32 1.1754944e-38, %v868_v23  ;;  %vm867_vm7 = vcmp.eq.f32.partialorder %v866_v42, 8.507059e+37 }
 0xd26   :  { %v1460_v17 = vpop.eup %1459 }
 0xd27   :  { %v858_v51 = vmul.f32 %v1460_v17, %v856_v16  ;;  %vm863_vm4 = vweird.f32 %v1460_v17  ;;  %v1462_v20 = vpop.eup %1461 }
 0xd28   :  { %vm864_vm6 = vmor %vm862_vm5, %vm863_vm4  ;;  %v922_v47 = vadd.f32 1.0, %v1462_v20 }
 0xd29   :  { %v859_v18 = vsub.f32 1.0, %v858_v51 }
 0xd2a   :  { %1463 = vrcp.f32 %v922_v47  ;;  %v934_v60 = vand.u32 2147483648, %v922_v47  ;;  %vm928_vm9 = vweird.f32 %v922_v47  ;;  %v932_v61 = vand.u32 2147483647, %v922_v47 }
 0xd2b   :  { %v860_v41 = vmul.f32 %v1460_v17, %v859_v18 }
 0xd2c   :  { %v935_v63 = vor.u32 1.1754944e-38, %v934_v60  ;;  %vm933_vm12 = vcmp.eq.f32.partialorder %v932_v61, 8.507059e+37 }
 0xd2d   :  { %v861_v19 = vadd.f32 %v1460_v17, %v860_v41 }
 0xd2f   :  { %v865_v48 = vsel %vm864_vm6, %v1460_v17, %v861_v19 }
 0xd30   :  { %v870_v52 = vsel %vm867_vm7, %v869_v49, %v865_v48  ;;  %v1464_v55 = vpop.eup %1463 }
 0xd31   :  { %v924_v56 = vmul.f32 %v1464_v55, %v922_v47  ;;  %vm929_vm8 = vweird.f32 %v1464_v55  ;;  %v873_v3 = vmul.f32 %v870_v52, %v1888_v25 }
 0xd32   :  { %vm930_vm11 = vmor %vm928_vm9, %vm929_vm8 }
 0xd33   :  { %v925_v57 = vsub.f32 1.0, %v924_v56 }
 0xd35   :  { %v926_v58 = vmul.f32 %v1464_v55, %v925_v57 }
 0xd37   :  { %v927_v59 = vadd.f32 %v1464_v55, %v926_v58 }
 0xd39   :  { %v931_v62 = vsel %vm930_vm11, %v1464_v55, %v927_v59 }
 0xd3a   :  { %v936_v1 = vsel %vm933_vm12, %v935_v63, %v931_v62 }
 0xd3b   :  { %v939_v6 = vmul.f32 %v936_v1, %v1893_v9 }
 0xd72   :  { %v876_v50 = vpop.permute.xlu2 %875 }
 0xd73   :  { %v878_v54 = vmul.f32 %v876_v50, %v870_v52 }
 0xd75   :  { %880 = vrot.lane.b32.xlu1 %v878_v54, %s1514_s28 }
 0xd8f   :  { %v942_v0 = vpop.permute.xlu0 %941 }
 0xd90   :  { %v944_v2 = vmul.f32 %v942_v0, %v936_v1 }
 0xd92   :  { %946 = vrot.lane.b32.xlu2 %v944_v2, %s1514_s28 }
 0xde7   :  { %v881_v4 = vpop.permute.xlu1 %880 }
 0xde8   :  { %v1915_v5 = vadd.f32 %v881_v4, %v873_v3 }
 0xdea   :  { %1465 = vtanh.f32 %v1915_v5 }
 0xdec   :  { %v947_v7 = vpop.permute.xlu2 %946 }
 0xded   :  { %v1919_v8 = vadd.f32 %v947_v7, %v939_v6 }
 0xdef   :  { %1467 = vtanh.f32 %v1919_v8 }
 0xdf0   :  { %v1466_v10 = vpop.eup %1465 }
 0xdf1   :  { %886 = vrot.lane.b32.xlu0 %v1466_v10, %s1513_s27 }
 0xdf5   :  { %v1468_v11 = vpop.eup %1467 }
 0xdf6   :  { %952 = vrot.lane.b32.xlu1 %v1468_v11, %s1513_s27 }
 0xe63   :  { %v887_v13 = vpop.permute.xlu0 %886 }
 0xe64   :  { %v889_v22 = vmul.f32 %v887_v13, %v870_v52 }
 0xe66   :  { %957 = vrot.lane.b32.xlu2 %v889_v22, %s1514_s28 }
 0xe68   :  { %v953_v25 = vpop.permute.xlu1 %952 }
 0xe69   :  { %v955_v12 = vmul.f32 %v953_v25, %v936_v1 }
 0xe6b   :  { %1021 = vrot.lane.b32.xlu0 %v955_v12, %s1513_s27 }
 0xec0   :  { %v958_v26 = vpop.permute.xlu2 %957 }
 0xec1   :  { %1355 = vmatmul.msk.f32.vlgmr.msra.gmra.mxu2 %vm171_vm10, %v958_v26 }
 0xedd   :  { %v1022_v29 = vpop.permute.xlu0 %1021 }
 0xede   :  { %v1024_v9 = vsel %vm171_vm10, %v958_v26, %v1022_v29 }
 0xedf   :  { %1357 = vmatmul.msk.f32.vlgmr.msrb.gmra.mxu3 %vm379_vm15, %v1024_v9 }
 0xf44   :  { %v978_v30 = vpop.f32.mrf.mxu2 }
 0xf45   :  { %v981_v33 = vadd.f32 %v978_v30, %v232_v32 }
 0xf47   :  { %1469 = vtanh.f32 %v981_v33  ;;  %v1356_v36 = vmul.f32 -1.442695, %v981_v33 }
 0xf4d   :  { %v1470_v34 = vpop.eup %1469 }
 0xf4e   :  { %1004 = vrot.lane.b32.xlu1 %v1470_v34, %s1513_s27 }
 0xf62   :  { %v1045_v24 = vpop.f32.mrf.mxu3 }
 0xf63   :  { %v1046_v21 = vadd.f32 %v1789_v27, %v1045_v24 }
 0xf65   :  { %1471 = vtanh.f32 %v1046_v21  ;;  %v1358_v37 = vmul.f32 -1.442695, %v1046_v21 }
 0xf66   :  { %1473 = vpow2.f32 %v1356_v36 }
 0xf67   :  { %1475 = vpow2.f32 %v1358_v37 }
 0xf6b   :  { %v1472_v35 = vpop.eup %1471 }
 0xf6c   :  { %1070 = vrot.lane.b32.xlu2 %v1472_v35, %s1513_s27  ;;  %v1474_v38 = vpop.eup %1473 }
 0xf6d   :  { %v985_v14 = vadd.f32 1.0, %v1474_v38  ;;  %v1476_v28 = vpop.eup %1475 }
 0xf6e   :  { %v1051_v43 = vadd.f32 1.0, %v1476_v28 }
 0xf6f   :  { %1477 = vrcp.f32 %v985_v14  ;;  %v997_v40 = vand.u32 2147483648, %v985_v14  ;;  %vm991_vm14 = vweird.f32 %v985_v14  ;;  %v995_v18 = vand.u32 2147483647, %v985_v14 }
 0xf70   :  { %1479 = vrcp.f32 %v1051_v43  ;;  %v1063_v48 = vand.u32 2147483648, %v1051_v43  ;;  %vm1057_vm3 = vweird.f32 %v1051_v43  ;;  %v1061_v50 = vand.u32 2147483647, %v1051_v43 }
 0xf71   :  { %v998_v20 = vor.u32 1.1754944e-38, %v997_v40  ;;  %vm996_vm1 = vcmp.eq.f32.partialorder %v995_v18, 8.507059e+37 }
 0xf72   :  { %v1064_v54 = vor.u32 1.1754944e-38, %v1063_v48  ;;  %vm1062_vm5 = vcmp.eq.f32.partialorder %v1061_v50, 8.507059e+37 }
 0xf75   :  { %v1478_v44 = vpop.eup %1477 }
 0xf76   :  { %v987_v45 = vmul.f32 %v1478_v44, %v985_v14  ;;  %v1480_v46 = vpop.eup %1479  ;;  %vm992_vm13 = vweird.f32 %v1478_v44 }
 0xf77   :  { %v1053_v39 = vmul.f32 %v1480_v46, %v1051_v43  ;;  %vm993_vm0 = vmor %vm991_vm14, %vm992_vm13  ;;  %vm1058_vm2 = vweird.f32 %v1480_v46 }
 0xf78   :  { %v988_v15 = vsub.f32 1.0, %v987_v45  ;;  %vm1059_vm4 = vmor %vm1057_vm3, %vm1058_vm2 }
 0xf79   :  { %v1054_v17 = vsub.f32 1.0, %v1053_v39 }
 0xf7a   :  { %v989_v16 = vmul.f32 %v1478_v44, %v988_v15 }
 0xf7b   :  { %v1055_v41 = vmul.f32 %v1480_v46, %v1054_v17 }
 0xf7c   :  { %v990_v51 = vadd.f32 %v1478_v44, %v989_v16 }
 0xf7d   :  { %v1056_v23 = vadd.f32 %v1480_v46, %v1055_v41 }
 0xf7e   :  { %v994_v19 = vsel %vm993_vm0, %v1478_v44, %v990_v51 }
 0xf7f   :  { %v999_v42 = vsel %vm996_vm1, %v998_v20, %v994_v19  ;;  %v1060_v52 = vsel %vm1059_vm4, %v1480_v46, %v1056_v23 }
 0xf80   :  { %v1065_v56 = vsel %vm1062_vm5, %v1064_v54, %v1060_v52  ;;  %v1002_v58 = vmul.f32 %v999_v42, %v1915_v5 }
 0xf81   :  { %v1068_v61 = vmul.f32 %v1065_v56, %v1919_v8 }
 0xfc0   :  { %v1005_v47 = vpop.permute.xlu1 %1004 }
 0xfc1   :  { %v1007_v49 = vmul.f32 %v1005_v47, %v999_v42 }
 0xfc3   :  { %1009 = vrot.lane.b32.xlu0 %v1007_v49, %s1514_s28 }
 0xfc6   :  { %v1071_v55 = vpop.permute.xlu2 %1070 }
 0xfc7   :  { %v1073_v57 = vmul.f32 %v1071_v55, %v1065_v56 }
 0xfc9   :  { %1075 = vrot.lane.b32.xlu1 %v1073_v57, %s1514_s28 }
0x1035   :  { %v1010_v59 = vpop.permute.xlu0 %1009 }
0x1036   :  { %v1939_v60 = vadd.f32 %v1010_v59, %v1002_v58 }
0x1038   :  { %1481 = vtanh.f32 %v1939_v60 }
0x103b   :  { %v1076_v62 = vpop.permute.xlu1 %1075 }
0x103c   :  { %v1943_v63 = vadd.f32 %v1076_v62, %v1068_v61  ;;  %v1510_v61 = vld [vmem:[%s1998_s6] ss:$0 sm:$0xff] }
0x103e   :  { %v1482_v0 = vpop.eup %1481  ;;  %1483 = vtanh.f32 %v1943_v63 }
0x103f   :  { %1015 = vrot.lane.b32.xlu2 %v1482_v0, %s1513_s27 }
0x1044   :  { %v1484_v1 = vpop.eup %1483 }
0x1045   :  { %1081 = vrot.lane.b32.xlu0 %v1484_v1, %s1513_s27 }
0x1099   :  { %v1016_v2 = vpop.permute.xlu2 %1015 }
0x109a   :  { %v1018_v3 = vmul.f32 %v1016_v2, %v999_v42 }
0x109c   :  { %1086 = vrot.lane.b32.xlu1 %v1018_v3, %s1514_s28 }
0x10b7   :  { %v1082_v4 = vpop.permute.xlu0 %1081 }
0x10b8   :  { %v1084_v5 = vmul.f32 %v1082_v4, %v1065_v56 }
0x10ba   :  { %1150 = vrot.lane.b32.xlu2 %v1084_v5, %s1513_s27 }
0x110e   :  { %v1087_v6 = vpop.permute.xlu1 %1086 }
0x110f   :  { %1359 = vmatmul.msk.f32.vlgmr.msrb.gmra.mxu2 %vm171_vm10, %v1087_v6 }
0x1114   :  { %v1151_v7 = vpop.permute.xlu2 %1150 }
0x1115   :  { %v1153_v8 = vsel %vm171_vm10, %v1087_v6, %v1151_v7 }
0x1116   :  { %1361 = vmatmul.msk.f32.vlgmr.msrb.gmra.mxu0 %vm379_vm15, %v1153_v8 }
0x1192   :  { %v1107_v10 = vpop.f32.mrf.mxu2 }
0x1193   :  { %v1110_v11 = vadd.f32 %v1107_v10, %v1681_v53  ;;  %v1174_v13 = vpop.f32.mrf.mxu0 }
0x1194   :  { %v1175_v22 = vadd.f32 %v1789_v27, %v1174_v13 }
0x1195   :  { %1485 = vtanh.f32 %v1110_v11  ;;  %v1360_v26 = vmul.f32 -1.442695, %v1110_v11 }
0x1196   :  { %1487 = vtanh.f32 %v1175_v22  ;;  %v1362_v29 = vmul.f32 -1.442695, %v1175_v22 }
0x1197   :  { %1489 = vpow2.f32 %v1360_v26 }
0x1198   :  { %1491 = vpow2.f32 %v1362_v29 }
0x119b   :  { %v1486_v25 = vpop.eup %1485 }
0x119c   :  { %v1488_v12 = vpop.eup %1487  ;;  %1133 = vrot.lane.b32.xlu0 %v1486_v25, %s1513_s27 }
0x119d   :  { %1199 = vrot.lane.b32.xlu1 %v1488_v12, %s1513_s27  ;;  %v1490_v9 = vpop.eup %1489 }
0x119e   :  { %v1492_v31 = vpop.eup %1491  ;;  %v1114_v32 = vadd.f32 1.0, %v1490_v9 }
0x119f   :  { %v1180_v30 = vadd.f32 1.0, %v1492_v31 }
0x11a0   :  { %1493 = vrcp.f32 %v1114_v32  ;;  %v1126_v38 = vand.u32 2147483648, %v1114_v32  ;;  %vm1120_vm8 = vweird.f32 %v1114_v32  ;;  %v1124_v28 = vand.u32 2147483647, %v1114_v32 }
0x11a1   :  { %1495 = vrcp.f32 %v1180_v30  ;;  %v1192_v43 = vand.u32 2147483648, %v1180_v30  ;;  %vm1186_vm11 = vweird.f32 %v1180_v30  ;;  %v1190_v44 = vand.u32 2147483647, %v1180_v30 }
0x11a2   :  { %v1127_v46 = vor.u32 1.1754944e-38, %v1126_v38  ;;  %vm1125_vm13 = vcmp.eq.f32.partialorder %v1124_v28, 8.507059e+37 }
0x11a3   :  { %v1193_v39 = vor.u32 1.1754944e-38, %v1192_v43  ;;  %vm1191_vm14 = vcmp.eq.f32.partialorder %v1190_v44, 8.507059e+37 }
0x11a6   :  { %v1494_v53 = vpop.eup %1493 }
0x11a7   :  { %v1496_v27 = vpop.eup %1495  ;;  %v1116_v33 = vmul.f32 %v1494_v53, %v1114_v32  ;;  %vm1121_vm6 = vweird.f32 %v1494_v53 }
0x11a8   :  { %v1182_v34 = vmul.f32 %v1496_v27, %v1180_v30  ;;  %vm1187_vm7 = vweird.f32 %v1496_v27  ;;  %vm1122_vm9 = vmor %vm1120_vm8, %vm1121_vm6 }
0x11a9   :  { %v1117_v24 = vsub.f32 1.0, %v1116_v33  ;;  %vm1188_vm12 = vmor %vm1186_vm11, %vm1187_vm7 }
0x11aa   :  { %v1183_v21 = vsub.f32 1.0, %v1182_v34 }
0x11ab   :  { %v1118_v35 = vmul.f32 %v1494_v53, %v1117_v24 }
0x11ac   :  { %v1184_v36 = vmul.f32 %v1496_v27, %v1183_v21 }
0x11ad   :  { %v1119_v37 = vadd.f32 %v1494_v53, %v1118_v35 }
0x11ae   :  { %v1185_v14 = vadd.f32 %v1496_v27, %v1184_v36 }
0x11af   :  { %v1123_v45 = vsel %vm1122_vm9, %v1494_v53, %v1119_v37 }
0x11b0   :  { %v1189_v15 = vsel %vm1188_vm12, %v1496_v27, %v1185_v14  ;;  %v1128_v17 = vsel %vm1125_vm13, %v1127_v46, %v1123_v45 }
0x11b1   :  { %v1194_v18 = vsel %vm1191_vm14, %v1193_v39, %v1189_v15  ;;  %v1131_v19 = vmul.f32 %v1128_v17, %v1939_v60 }
0x11b2   :  { %v1197_v47 = vmul.f32 %v1194_v18, %v1943_v63 }
0x120e   :  { %v1134_v16 = vpop.permute.xlu0 %1133 }
0x120f   :  { %v1136_v51 = vmul.f32 %v1134_v16, %v1128_v17  ;;  %v1200_v40 = vpop.permute.xlu1 %1199 }
0x1210   :  { %v1202_v41 = vmul.f32 %v1200_v40, %v1194_v18 }
0x1211   :  { %1138 = vrot.lane.b32.xlu2 %v1136_v51, %s1514_s28 }
0x1212   :  { %1204 = vrot.lane.b32.xlu0 %v1202_v41, %s1514_s28 }
0x126b   :  { %v1139_v20 = vpop.permute.xlu2 %1138 }
0x126c   :  { %v1141_v23 = vadd.f32 %v1139_v20, %v1131_v19 }
0x126e   :  { %1497 = vtanh.f32 %v1141_v23 }
0x1274   :  { %v1498_v42 = vpop.eup %1497 }
0x1275   :  { %1144 = vrot.lane.b32.xlu1 %v1498_v42, %s1513_s27 }
0x1284   :  { %v1205_v48 = vpop.permute.xlu0 %1204 }
0x1285   :  { %v1207_v49 = vadd.f32 %v1205_v48, %v1197_v47 }
0x1287   :  { %1499 = vtanh.f32 %v1207_v49 }
0x128d   :  { %v1500_v50 = vpop.eup %1499 }
0x128e   :  { %1210 = vrot.lane.b32.xlu2 %v1500_v50, %s1513_s27 }
0x12e7   :  { %v1145_v52 = vpop.permute.xlu1 %1144 }
0x12e8   :  { %v1147_v54 = vmul.f32 %v1145_v52, %v1128_v17  ;;  %v1211_v55 = vpop.permute.xlu2 %1210 }
0x12e9   :  { %v1213_v56 = vmul.f32 %v1211_v55, %v1194_v18 }
0x12ea   :  { %1215 = vrot.lane.b32.xlu0 %v1147_v54, %s1514_s28 }
0x12eb   :  { %1219 = vrot.lane.b32.xlu1 %v1213_v56, %s1513_s27 }
0x135c   :  { %v1216_v57 = vpop.permute.xlu0 %1215 }
0x135d   :  { %1283 = vst.msk [vmem:[%s1999_s7] sm:$0xff] %vm171_vm10, %v1216_v57  ;;  %v1220_v58 = vpop.permute.xlu1 %1219 }
0x135e   :  { %v1222_v59 = vsel %vm171_vm10, %v1216_v57, %v1220_v58 }
0x135f   :  { %1363 = vmatmul.msk.f32.vlgmr.msra.gmra.mxu1 %vm379_vm15, %v1222_v59 }
0x13dc   :  { %v1243_v60 = vpop.f32.mrf.mxu1 }
0x13dd   :  { %v1244_v62 = vadd.f32 %v1510_v61, %v1243_v60 }
0x13df   :  { %1501 = vtanh.f32 %v1244_v62  ;;  %v1364_v0 = vmul.f32 -1.442695, %v1244_v62 }
0x13e1   :  { %1503 = vpow2.f32 %v1364_v0 }
0x13e5   :  { %v1502_v63 = vpop.eup %1501 }
0x13e6   :  { %1268 = vrot.lane.b32.xlu2 %v1502_v63, %s1513_s27 }
0x13e7   :  { %v1504_v1 = vpop.eup %1503 }
0x13e8   :  { %v1249_v2 = vadd.f32 1.0, %v1504_v1 }
0x13ea   :  { %1505 = vrcp.f32 %v1249_v2  ;;  %v1261_v8 = vand.u32 2147483648, %v1249_v2  ;;  %vm1255_vm0 = vweird.f32 %v1249_v2  ;;  %v1259_v10 = vand.u32 2147483647, %v1249_v2 }
0x13ec   :  { %v1262_v13 = vor.u32 1.1754944e-38, %v1261_v8  ;;  %vm1260_vm2 = vcmp.eq.f32.partialorder %v1259_v10, 8.507059e+37 }
0x13ee   :  { %1285 = vrot.lane.b32.xlu2 %v1141_v23, %s1515_s3 }
0x13f0   :  { %v1506_v3 = vpop.eup %1505 }
0x13f1   :  { %v1251_v4 = vmul.f32 %v1506_v3, %v1249_v2  ;;  %vm1256_vm15 = vweird.f32 %v1506_v3 }
0x13f2   :  { %vm1257_vm1 = vmor %vm1255_vm0, %vm1256_vm15 }
0x13f3   :  { %v1252_v5 = vsub.f32 1.0, %v1251_v4 }
0x13f5   :  { %v1253_v6 = vmul.f32 %v1506_v3, %v1252_v5 }
0x13f7   :  { %v1254_v7 = vadd.f32 %v1506_v3, %v1253_v6 }
0x13f9   :  { %v1258_v11 = vsel %vm1257_vm1, %v1506_v3, %v1254_v7 }
0x13fa   :  { %v1263_v25 = vsel %vm1260_vm2, %v1262_v13, %v1258_v11 }
0x13fb   :  { %v1266_v29 = vmul.f32 %v1263_v25, %v1207_v49 }
0x1440   :  { %v1269_v22 = vpop.permute.xlu2 %1268 }
0x1441   :  { %v1271_v12 = vmul.f32 %v1269_v22, %v1263_v25 }
0x1443   :  { %1273 = vrot.lane.b32.xlu0 %v1271_v12, %s1514_s28 }
0x1448   :  { %v1286_v26 = vpop.permute.xlu2 %1285 }
0x1449   :  { %1288 = vst.msk [vmem:[%s2000_s8] sm:$0xff] %vm171_vm10, %v1286_v26 }
0x14b5   :  { %v1274_v9 = vpop.permute.xlu0 %1273 }
0x14b6   :  { %v1276_v31 = vadd.f32 %v1274_v9, %v1266_v29 }
0x14b8   :  { %1507 = vtanh.f32 %v1276_v31 }
0x14be   :  { %v1508_v32 = vpop.eup %1507 }
0x14bf   :  { %1279 = vrot.lane.b32.xlu1 %v1508_v32, %s1513_s27 }
0x14c7   :  { %1296 = vrot.lane.b32.xlu1 %v1276_v31, %s1515_s3 }
0x1531   :  { %v1280_v30 = vpop.permute.xlu1 %1279 }
0x1532   :  { %v1282_v53 = vmul.f32 %v1280_v30, %v1263_v25 }
0x1534   :  { %1290 = vrot.lane.b32.xlu0 %v1282_v53, %s1514_s28 }
0x1539   :  { %v1297_v27 = vpop.permute.xlu1 %1296 }
0x153a   :  { %1366 = vst.msk [vmem:[%s2000_s8 + $0x8] sm:$0xff] %vm171_vm10, %v1297_v27 }
0x15a6   :  { %v1291_v33 = vpop.permute.xlu0 %1290 }
0x15a7   :  { %1365 = vst.msk [vmem:[%s1999_s7 + $0x8] sm:$0xff] %vm171_vm10, %v1291_v33 }

</bundles_post_ra>
